<compile_context>
chip_gen: v7x
topology: tpu7x:2x2x1
jax: 0.10.0
libtpu: 0.0.40
codegen_flags: <defaults>
</compile_context>

<pallas_src>
import functools
import math

import jax
import jax.numpy as jnp
from jax import lax
from jax.experimental import pallas as pl
from jax.experimental.pallas import tpu as pltpu  # noqa: F401  (TPU backend)


# ----------------------------- config ------------------------------------ #
class Config:
    vocab_size = 100
    embedding_size = 32
    model_dim = 32
    num_heads = 4
    dropout = 0.1            # eval mode -> identity
    hidden_size = 16
    essay_grade_num = 5
    max_essay_len = 8


# --------------------- packed-parameter layout ---------------------------- #
def _param_layout(cfg):
    """Row layout of the single packed (rows, 128) f32 weight buffer."""
    E, M, H = cfg.embedding_size, cfg.model_dim, cfg.hidden_size
    G = cfg.essay_grade_num
    entries = [
        ("Wa", E, 3 * M), ("ba", 1, 3 * M),
        ("W2", 3 * M, 3 * M), ("b2", 1, 3 * M),
        ("Wo", M, M), ("bo", 1, M), ("gamma", 1, M), ("beta", 1, M),
        ("Wih0", 2 * M, 8 * H), ("bg0", 1, 8 * H), ("Whh0", 2 * H, 8 * H),
        ("Wih1", 4 * H, 8 * H), ("bg1", 1, 8 * H), ("Whh1", 2 * H, 8 * H),
        ("fcw", 2 * H, G), ("fcb", 1, G),
    ]
    layout = {}
    off = 0
    for name, r, c in entries:
        layout[name] = (off, r, c)
        off += r
    total_rows = -(-off // 8) * 8
    ncols = -(-max(c for _, _, c in entries) // 128) * 128
    return layout, total_rows, ncols


# ----------------------------- fused kernel ------------------------------ #
def mha_fused_kernel(x_ref, w_ref, out_ref, *,
                     layout, B, S, M, Hn, D, Hh, inv_len, eps):
    f32 = jnp.float32
    NBS = B * S

    def par(name):                                   # static slice of packed buffer
        off, r, c = layout[name]
        return w_ref[off:off + r, 0:c]

    x = x_ref[...]                                                    # (B*S, E)

    # ---- fused first projection: [q | k | v] = x @ [Waq|Wak|Wav] + b ----
    qkv = jnp.dot(x, par("Wa"), preferred_element_type=f32) + par("ba")
    res = qkv[:, 0:M]                         # residual = attention_q output

    # ---- fused second projection (block-diag; 1/sqrt(M) folded into q) ---
    qkv2 = jnp.dot(qkv, par("W2"), preferred_element_type=f32) + par("b2")

    # ---- head grouping: reproduces torch .view(B*H, -1, D) on (B,S,M) ---
    # stacked row (m*NBS + p) = feature chunk m of token-row p.
    def stack_heads(t):
        return jnp.concatenate([t[:, m * D:(m + 1) * D] for m in range(Hn)],
                               axis=0)                                # (Hn*NBS, D)

    q_st = stack_heads(qkv2[:, 0:M])
    k_st = stack_heads(qkv2[:, M:2 * M])
    v_st = stack_heads(qkv2[:, 2 * M:3 * M])

    # ---- in-kernel head-group mask (float-only index arithmetic) ---------
    n = Hn * NBS
    ri = lax.broadcasted_iota(jnp.int32, (n, n), 0).astype(f32)
    ci = lax.broadcasted_iota(jnp.int32, (n, n), 1).astype(f32)

    def group_id(idx):                       # idx = m*NBS + p ; group = (p*Hn+m)//S
        m = jnp.floor((idx + 0.5) * (1.0 / NBS))
        p = idx - m * NBS
        return jnp.floor((p * Hn + m + 0.5) * (1.0 / S))

    same = group_id(ri) == group_id(ci)

    # ---- all head groups in one masked matmul + softmax ------------------
    sc = jnp.einsum("qd,kd->qk", q_st, k_st, preferred_element_type=f32)
    sc = jnp.where(same, sc, -1e30)
    sc = sc - jnp.max(sc, axis=-1, keepdims=True)
    e = jnp.exp(sc)
    pr = e * pl.reciprocal(jnp.sum(e, axis=-1, keepdims=True), approx=True)
    ctx_st = jnp.dot(pr, v_st, preferred_element_type=f32)            # (Hn*NBS, D)
    ctx = jnp.concatenate([ctx_st[m * NBS:(m + 1) * NBS, :] for m in range(Hn)],
                          axis=1)                                     # (NBS, M)

    # ---- out projection + residual + LayerNorm (dropout == identity) ----
    y = jnp.dot(ctx, par("Wo"), preferred_element_type=f32) + par("bo")
    y = res + y
    mean = jnp.sum(y, axis=-1, keepdims=True) * (1.0 / M)
    d = y - mean
    var = jnp.sum(d * d, axis=-1, keepdims=True) * (1.0 / M)
    y = d * lax.rsqrt(var + eps) * par("gamma") + par("beta")         # (NBS, M)

    # ---- permutation constants built from iota (no row slice/concat) -----
    # P : (b,s) row order -> time-major (s,b);  R : time reversal (time-major)
    rti = lax.broadcasted_iota(jnp.int32, (NBS, NBS), 0).astype(f32)
    cti = lax.broadcasted_iota(jnp.int32, (NBS, NBS), 1).astype(f32)
    s_of = jnp.floor((rti + 0.5) * (1.0 / B))
    b_of = rti - s_of * B
    P = jnp.where(cti == b_of * S + s_of, 1.0, 0.0).astype(f32)
    R = jnp.where(cti == (S - 1 - s_of) * B + b_of, 1.0, 0.0).astype(f32)

    H2 = 2 * Hh

    def run_bilstm(gx, whh):
        # gx: (S*B, 8H) hoisted input gates (+bias), time-major, fwd/bwd mixed.
        hc = jnp.zeros((B, H2), f32)         # [h_fwd | h_bwd]
        cc = jnp.zeros((B, H2), f32)         # [c_fwd | c_bwd]
        outs = []
        for t in range(S):                   # static unroll (S is small)
            g = gx[t * B:(t + 1) * B, :]
            if t > 0:                        # h == 0 at t == 0
                g = g + jnp.dot(hc, whh, preferred_element_type=f32)
            sg = jax.nn.sigmoid(g[:, 0:6 * Hh])      # i,f,o of BOTH dirs: 1 EUP op
            gg = jnp.tanh(g[:, 6 * Hh:8 * Hh])       # g of both dirs
            cc = sg[:, 2 * Hh:4 * Hh] * cc + sg[:, 0:2 * Hh] * gg
            hc = sg[:, 4 * Hh:6 * Hh] * jnp.tanh(cc)
            outs.append(hc)
        return outs

    # ---- LSTM layer 0 (input projection hoisted out of the recurrence) --
    y_tm = jnp.dot(P, y, preferred_element_type=f32)                  # (S*B, M)
    y_rv = jnp.dot(R, y_tm, preferred_element_type=f32)               # time-reversed
    gx0 = (jnp.dot(jnp.concatenate([y_tm, y_rv], axis=1), par("Wih0"),
                   preferred_element_type=f32) + par("bg0"))          # (S*B, 8H)
    outs0 = run_bilstm(gx0, par("Whh0"))

    # layer-1 input: [fwd_out(t) | bwd_out(t)] and its time reversal
    O = jnp.concatenate(outs0, axis=0)                                # (S*B, 2H)
    RO = jnp.dot(R, O, preferred_element_type=f32)
    xcat1 = jnp.concatenate([O[:, 0:Hh], RO[:, Hh:H2],
                             RO[:, 0:Hh], O[:, Hh:H2]], axis=1)       # (S*B, 4H)

    # ---- LSTM layer 1 -----------------------------------------------------
    gx1 = (jnp.dot(xcat1, par("Wih1"), preferred_element_type=f32) + par("bg1"))
    outs1 = run_bilstm(gx1, par("Whh1"))

    # ---- mean pool over time + FC + sigmoid (fused epilogue) --------------
    pooled = outs1[0]
    for t in range(1, S):
        pooled = pooled + outs1[t]
    pooled = pooled * inv_len                                         # (B, 2H)

    logits = jnp.dot(pooled, par("fcw"), preferred_element_type=f32) + par("fcb")
    out_ref[...] = jax.nn.sigmoid(logits)


# ----------------------------- param fusion -------------------------------- #
# LSTM gate-chunk order: i_f i_b f_f f_b o_f o_b g_f g_b
# (PyTorch gate chunk indices: i=0, f=1, g=2, o=3)
_GATE_ORDER = ((0, "f"), (0, "r"), (1, "f"), (1, "r"),
               (3, "f"), (3, "r"), (2, "f"), (2, "r"))


def _fuse_lstm_layer(p, l, H):
    wih = {"f": p[f"w_ih_l{l}"], "r": p[f"w_ih_l{l}_rev"]}            # (4H, Din)
    whh = {"f": p[f"w_hh_l{l}"], "r": p[f"w_hh_l{l}_rev"]}            # (4H, H)
    bias = {"f": p[f"b_ih_l{l}"] + p[f"b_hh_l{l}"],
            "r": p[f"b_ih_l{l}_rev"] + p[f"b_hh_l{l}_rev"]}           # (4H,)
    din = wih["f"].shape[1]
    zin = jnp.zeros((din, H), jnp.float32)
    zh = jnp.zeros((H, H), jnp.float32)
    wih_cols, whh_cols, b_cols = [], [], []
    for g, d in _GATE_ORDER:
        wi = wih[d][g * H:(g + 1) * H, :].T                           # (Din, H)
        wh = whh[d][g * H:(g + 1) * H, :].T                           # (H, H)
        if d == "f":
            wih_cols.append(jnp.concatenate([wi, zin], axis=0))       # rows: [x_t | x_rev]
            whh_cols.append(jnp.concatenate([wh, zh], axis=0))        # rows: [h_f | h_b]
        else:
            wih_cols.append(jnp.concatenate([zin, wi], axis=0))
            whh_cols.append(jnp.concatenate([zh, wh], axis=0))
        b_cols.append(bias[d][g * H:(g + 1) * H])
    return (jnp.concatenate(wih_cols, axis=1),                        # (2*Din, 8H)
            jnp.concatenate(whh_cols, axis=1),                        # (2H, 8H)
            jnp.concatenate(b_cols)[None, :])                         # (1, 8H)


def fuse_params(p, cfg):
    M, H = cfg.model_dim, cfg.hidden_size
    scale = 1.0 / math.sqrt(M)
    z = jnp.zeros((M, M), jnp.float32)

    mats = {
        "Wa": jnp.concatenate([p["Waq"], p["Wak"], p["Wav"]], axis=1),
        "ba": jnp.concatenate([p["baq"], p["bak"], p["bav"]])[None, :],
        # block-diagonal second projection; score scale folded into q block
        "W2": jnp.concatenate([
            jnp.concatenate([p["Wq2"] * scale, z, z], axis=1),
            jnp.concatenate([z, p["Wk2"], z], axis=1),
            jnp.concatenate([z, z, p["Wv2"]], axis=1)], axis=0),
        "b2": jnp.concatenate([p["bq2"] * scale, p["bk2"], p["bv2"]])[None, :],
        "Wo": p["Wo"], "bo": p["bo"][None, :],
        "gamma": p["ln_gamma"][None, :], "beta": p["ln_beta"][None, :],
        "fcw": p["fc_w"], "fcb": p["fc_b"][None, :],
    }
    for l in range(2):
        wih, whh, bg = _fuse_lstm_layer(p, l, H)
        mats[f"Wih{l}"] = wih
        mats[f"Whh{l}"] = whh
        mats[f"bg{l}"] = bg

    layout, rows, cols = _param_layout(cfg)
    buf = jnp.zeros((rows, cols), jnp.float32)
    for name, (off, r, c) in layout.items():
        m = mats[name].astype(jnp.float32)
        assert m.shape == (r, c), (name, m.shape, (r, c))
        buf = buf.at[off:off + r, 0:c].set(m)
    return {"emb": p["embedding"], "wbuf": buf}


# ----------------------------- wrapper ------------------------------------ #
def mha_forward(fused, x, cfg):
    B, S = x.shape
    M = cfg.model_dim
    Hn = cfg.num_heads
    D = M // Hn
    Hh = cfg.hidden_size
    G = cfg.essay_grade_num

    # Embedding gather stays in plain JAX (single XLA op, tiny result).
    # TODO(synk): data-dependent gather could be DMA'd inside the kernel, but
    # is not worth it at this size.
    embed = jnp.take(fused["emb"], x.reshape(-1), axis=0)             # (B*S, E)

    layout, _, _ = _param_layout(cfg)
    kern = functools.partial(
        mha_fused_kernel, layout=layout, B=B, S=S, M=M, Hn=Hn, D=D, Hh=Hh,
        inv_len=1.0 / cfg.max_essay_len, eps=1e-5)

    return pl.pallas_call(
        kern,
        out_shape=jax.ShapeDtypeStruct((B, G), jnp.float32),
    )(embed, fused["wbuf"])


# ----------------------------- params ------------------------------------ #
def init_params(cfg, key):
    E, M, H = cfg.embedding_size, cfg.model_dim, cfg.hidden_size
    G = cfg.essay_grade_num
    keys = iter(jax.random.split(key, 64))

    def w(shape, scale=0.05):
        return scale * jax.random.normal(next(keys), shape, jnp.float32)

    p = {
        "embedding": w((cfg.vocab_size, E)),
        # linear weights stored as (in, out)
        "Waq": w((E, M)), "baq": w((M,)),
        "Wak": w((E, M)), "bak": w((M,)),
        "Wav": w((E, M)), "bav": w((M,)),
        "Wq2": w((M, M)), "bq2": w((M,)),
        "Wk2": w((M, M)), "bk2": w((M,)),
        "Wv2": w((M, M)), "bv2": w((M,)),
        "Wo":  w((M, M)), "bo":  w((M,)),
        "ln_gamma": jnp.ones((M,), jnp.float32),
        "ln_beta":  jnp.zeros((M,), jnp.float32),
        "fc_w": w((2 * H, G)), "fc_b": w((G,)),
    }
    # 2-layer bidirectional LSTM in PyTorch layout: (4H, Din), (4H, H)
    for layer in range(2):
        din = M if layer == 0 else 2 * H
        for suffix in ("", "_rev"):
            p[f"w_ih_l{layer}{suffix}"] = w((4 * H, din))
            p[f"w_hh_l{layer}{suffix}"] = w((4 * H, H))
            p[f"b_ih_l{layer}{suffix}"] = w((4 * H,))
            p[f"b_hh_l{layer}{suffix}"] = w((4 * H,))
    return p


# ----------------------------- reference (plain JAX) ---------------------- #
def reference_forward(params, x, cfg):
    B, S = x.shape
    M, Hn = cfg.model_dim, cfg.num_heads
    D = M // Hn
    Hh = cfg.hidden_size
    emb = jnp.take(params["embedding"], x.reshape(-1), axis=0)
    q = emb @ params["Waq"] + params["baq"]
    k = emb @ params["Wak"] + params["bak"]
    v = emb @ params["Wav"] + params["bav"]
    res = q
    q2 = q @ params["Wq2"] + params["bq2"]
    k2 = k @ params["Wk2"] + params["bk2"]
    v2 = v @ params["Wv2"] + params["bv2"]
    q3 = q2.reshape(B * Hn, -1, D)
    k3 = k2.reshape(B * Hn, -1, D)
    v3 = v2.reshape(B * Hn, -1, D)
    att = jnp.einsum("gqd,gkd->gqk", q3, k3) * (1.0 / math.sqrt(M))
    att = jax.nn.softmax(att, axis=-1)
    ctx = jnp.einsum("gqk,gkd->gqd", att, v3).reshape(B * S, M)
    y = ctx @ params["Wo"] + params["bo"] + res
    mean = jnp.mean(y, axis=-1, keepdims=True)
    var = jnp.mean((y - mean) ** 2, axis=-1, keepdims=True)
    y = (y - mean) / jnp.sqrt(var + 1e-5) * params["ln_gamma"] + params["ln_beta"]
    seq = y.reshape(B, S, M).transpose(1, 0, 2)                       # (S, B, M)

    def run_dir(xs, wih, whh, bih, bhh, reverse):
        h = jnp.zeros((B, Hh), jnp.float32)
        c = jnp.zeros((B, Hh), jnp.float32)
        outs = [None] * S
        order = range(S - 1, -1, -1) if reverse else range(S)
        for t in order:
            g = xs[t] @ wih.T + h @ whh.T + bih + bhh
            i = jax.nn.sigmoid(g[:, 0:Hh])
            f = jax.nn.sigmoid(g[:, Hh:2 * Hh])
            gg = jnp.tanh(g[:, 2 * Hh:3 * Hh])
            o = jax.nn.sigmoid(g[:, 3 * Hh:4 * Hh])
            c = f * c + i * gg
            h = o * jnp.tanh(c)
            outs[t] = h
        return jnp.stack(outs, axis=0)                                # (S, B, H)

    inp = seq
    for l in range(2):
        fwd = run_dir(inp, params[f"w_ih_l{l}"], params[f"w_hh_l{l}"],
                      params[f"b_ih_l{l}"], params[f"b_hh_l{l}"], False)
        bwd = run_dir(inp, params[f"w_ih_l{l}_rev"], params[f"w_hh_l{l}_rev"],
                      params[f"b_ih_l{l}_rev"], params[f"b_hh_l{l}_rev"], True)
        inp = jnp.concatenate([fwd, bwd], axis=-1)
    rnn = inp.transpose(1, 0, 2)                                      # (B, S, 2H)
    pooled = jnp.sum(rnn, axis=1) * (1.0 / cfg.max_essay_len)
    return jax.nn.sigmoid(pooled @ params["fc_w"] + params["fc_b"])


# ------------------------------- main ------------------------------------ #
if __name__ == "__main__":
    cfg = Config()
    key = jax.random.PRNGKey(0)
    pkey, xkey = jax.random.split(key)

    params = init_params(cfg, pkey)
    B, S = 2, 8
    x = jax.random.randint(xkey, (B, S), 0, cfg.vocab_size, dtype=jnp.int32)

    fused = fuse_params(params, cfg)
    fwd = jax.jit(functools.partial(mha_forward, cfg=cfg))
    out = jax.block_until_ready(fwd(fused, x))

    assert out.shape == (B, cfg.essay_grade_num)
    assert bool(jnp.all(jnp.isfinite(out)))
    assert bool(jnp.all((out >= 0.0) & (out <= 1.0)))

    ref = reference_forward(params, x, cfg)
    assert bool(jnp.allclose(out, ref, atol=2e-2)), (out, ref)
    print("KERNEL_OK")
</pallas_src>

<mosaic_0001>
module attributes {stable_mosaic.version = 11 : i64} {
  func.func @mha_fused_kernel(%arg0: memref<16x32xf32, #tpu.memory_space<vmem>>, %arg1: memref<392x128xf32, #tpu.memory_space<vmem>>, %arg2: memref<2x5xf32, #tpu.memory_space<vmem>>) attributes {dimension_semantics = [], scalar_prefetch = 0 : i64, scratch_operands = 0 : i64, tpu.core_type = #tpu.core_type<tc>} {
    %c0 = arith.constant 0 : index
    %c0_0 = arith.constant 0 : index
    %0 = vector.load %arg0[%c0, %c0_0] : memref<16x32xf32, #tpu.memory_space<vmem>>, vector<16x32xf32>
    %c0_1 = arith.constant 0 : index
    %c0_2 = arith.constant 0 : index
    %1 = vector.load %arg1[%c0_1, %c0_2] : memref<392x128xf32, #tpu.memory_space<vmem>>, vector<32x96xf32>
    %cst = arith.constant dense<0.000000e+00> : vector<16x96xf32>
    %2 = tpu.matmul %0, %1, %cst {dimension_numbers = #tpu.dot_dimension_numbers<[1], [0], [0], [1], [0, 0, 1, 1], [], []>} : vector<16x32xf32>, vector<32x96xf32>, vector<16x96xf32> -> vector<16x96xf32>
    %c32 = arith.constant 32 : index
    %c0_3 = arith.constant 0 : index
    %3 = vector.load %arg1[%c32, %c0_3] : memref<392x128xf32, #tpu.memory_space<vmem>>, vector<1x96xf32>
    %4 = vector.broadcast %3 : vector<1x96xf32> to vector<16x96xf32>
    %5 = arith.addf %2, %4 : vector<16x96xf32>
    %6 = vector.extract_strided_slice %5 {offsets = [0, 0], sizes = [16, 32], strides = [1, 1]} : vector<16x96xf32> to vector<16x32xf32>
    %c33 = arith.constant 33 : index
    %c0_4 = arith.constant 0 : index
    %7 = vector.load %arg1[%c33, %c0_4] : memref<392x128xf32, #tpu.memory_space<vmem>>, vector<96x96xf32>
    %cst_5 = arith.constant dense<0.000000e+00> : vector<16x96xf32>
    %8 = tpu.matmul %5, %7, %cst_5 {dimension_numbers = #tpu.dot_dimension_numbers<[1], [0], [0], [1], [0, 0, 1, 1], [], []>} : vector<16x96xf32>, vector<96x96xf32>, vector<16x96xf32> -> vector<16x96xf32>
    %c129 = arith.constant 129 : index
    %c0_6 = arith.constant 0 : index
    %9 = vector.load %arg1[%c129, %c0_6] : memref<392x128xf32, #tpu.memory_space<vmem>>, vector<1x96xf32>
    %10 = vector.broadcast %9 : vector<1x96xf32> to vector<16x96xf32>
    %11 = arith.addf %8, %10 : vector<16x96xf32>
    %12 = vector.extract_strided_slice %11 {offsets = [0, 0], sizes = [16, 32], strides = [1, 1]} : vector<16x96xf32> to vector<16x32xf32>
    %13 = vector.extract_strided_slice %12 {offsets = [0, 0], sizes = [16, 8], strides = [1, 1]} : vector<16x32xf32> to vector<16x8xf32>
    %14 = vector.extract_strided_slice %12 {offsets = [0, 8], sizes = [16, 8], strides = [1, 1]} : vector<16x32xf32> to vector<16x8xf32>
    %15 = vector.extract_strided_slice %12 {offsets = [0, 16], sizes = [16, 8], strides = [1, 1]} : vector<16x32xf32> to vector<16x8xf32>
    %16 = vector.extract_strided_slice %12 {offsets = [0, 24], sizes = [16, 8], strides = [1, 1]} : vector<16x32xf32> to vector<16x8xf32>
    %17 = tpu.concatenate %13, %14, %15, %16 in 0 : vector<16x8xf32>, vector<16x8xf32>, vector<16x8xf32>, vector<16x8xf32> -> vector<64x8xf32>
    %18 = vector.extract_strided_slice %11 {offsets = [0, 32], sizes = [16, 32], strides = [1, 1]} : vector<16x96xf32> to vector<16x32xf32>
    %19 = vector.extract_strided_slice %18 {offsets = [0, 0], sizes = [16, 8], strides = [1, 1]} : vector<16x32xf32> to vector<16x8xf32>
    %20 = vector.extract_strided_slice %18 {offsets = [0, 8], sizes = [16, 8], strides = [1, 1]} : vector<16x32xf32> to vector<16x8xf32>
    %21 = vector.extract_strided_slice %18 {offsets = [0, 16], sizes = [16, 8], strides = [1, 1]} : vector<16x32xf32> to vector<16x8xf32>
    %22 = vector.extract_strided_slice %18 {offsets = [0, 24], sizes = [16, 8], strides = [1, 1]} : vector<16x32xf32> to vector<16x8xf32>
    %23 = tpu.concatenate %19, %20, %21, %22 in 0 : vector<16x8xf32>, vector<16x8xf32>, vector<16x8xf32>, vector<16x8xf32> -> vector<64x8xf32>
    %24 = vector.extract_strided_slice %11 {offsets = [0, 64], sizes = [16, 32], strides = [1, 1]} : vector<16x96xf32> to vector<16x32xf32>
    %25 = vector.extract_strided_slice %24 {offsets = [0, 0], sizes = [16, 8], strides = [1, 1]} : vector<16x32xf32> to vector<16x8xf32>
    %26 = vector.extract_strided_slice %24 {offsets = [0, 8], sizes = [16, 8], strides = [1, 1]} : vector<16x32xf32> to vector<16x8xf32>
    %27 = vector.extract_strided_slice %24 {offsets = [0, 16], sizes = [16, 8], strides = [1, 1]} : vector<16x32xf32> to vector<16x8xf32>
    %28 = vector.extract_strided_slice %24 {offsets = [0, 24], sizes = [16, 8], strides = [1, 1]} : vector<16x32xf32> to vector<16x8xf32>
    %29 = tpu.concatenate %25, %26, %27, %28 in 0 : vector<16x8xf32>, vector<16x8xf32>, vector<16x8xf32>, vector<16x8xf32> -> vector<64x8xf32>
    %30 = tpu.iota {dimensions = array<i32: 0>} : vector<64x64xi32>
    %31 = arith.sitofp %30 : vector<64x64xi32> to vector<64x64xf32>
    %32 = tpu.iota {dimensions = array<i32: 1>} : vector<64x64xi32>
    %33 = arith.sitofp %32 : vector<64x64xi32> to vector<64x64xf32>
    %cst_7 = arith.constant 5.000000e-01 : f32
    %34 = vector.broadcast %cst_7 : f32 to vector<64x64xf32>
    %35 = arith.addf %31, %34 : vector<64x64xf32>
    %cst_8 = arith.constant 6.250000e-02 : f32
    %36 = vector.broadcast %cst_8 : f32 to vector<64x64xf32>
    %37 = arith.mulf %35, %36 : vector<64x64xf32>
    %38 = math.floor %37 : vector<64x64xf32>
    %cst_9 = arith.constant 1.600000e+01 : f32
    %39 = vector.broadcast %cst_9 : f32 to vector<64x64xf32>
    %40 = arith.mulf %38, %39 : vector<64x64xf32>
    %41 = arith.subf %31, %40 : vector<64x64xf32>
    %cst_10 = arith.constant 4.000000e+00 : f32
    %42 = vector.broadcast %cst_10 : f32 to vector<64x64xf32>
    %43 = arith.mulf %41, %42 : vector<64x64xf32>
    %44 = arith.addf %43, %38 : vector<64x64xf32>
    %cst_11 = arith.constant 5.000000e-01 : f32
    %45 = vector.broadcast %cst_11 : f32 to vector<64x64xf32>
    %46 = arith.addf %44, %45 : vector<64x64xf32>
    %cst_12 = arith.constant 1.250000e-01 : f32
    %47 = vector.broadcast %cst_12 : f32 to vector<64x64xf32>
    %48 = arith.mulf %46, %47 : vector<64x64xf32>
    %49 = math.floor %48 : vector<64x64xf32>
    %cst_13 = arith.constant 5.000000e-01 : f32
    %50 = vector.broadcast %cst_13 : f32 to vector<64x64xf32>
    %51 = arith.addf %33, %50 : vector<64x64xf32>
    %cst_14 = arith.constant 6.250000e-02 : f32
    %52 = vector.broadcast %cst_14 : f32 to vector<64x64xf32>
    %53 = arith.mulf %51, %52 : vector<64x64xf32>
    %54 = math.floor %53 : vector<64x64xf32>
    %cst_15 = arith.constant 1.600000e+01 : f32
    %55 = vector.broadcast %cst_15 : f32 to vector<64x64xf32>
    %56 = arith.mulf %54, %55 : vector<64x64xf32>
    %57 = arith.subf %33, %56 : vector<64x64xf32>
    %cst_16 = arith.constant 4.000000e+00 : f32
    %58 = vector.broadcast %cst_16 : f32 to vector<64x64xf32>
    %59 = arith.mulf %57, %58 : vector<64x64xf32>
    %60 = arith.addf %59, %54 : vector<64x64xf32>
    %cst_17 = arith.constant 5.000000e-01 : f32
    %61 = vector.broadcast %cst_17 : f32 to vector<64x64xf32>
    %62 = arith.addf %60, %61 : vector<64x64xf32>
    %cst_18 = arith.constant 1.250000e-01 : f32
    %63 = vector.broadcast %cst_18 : f32 to vector<64x64xf32>
    %64 = arith.mulf %62, %63 : vector<64x64xf32>
    %65 = math.floor %64 : vector<64x64xf32>
    %66 = arith.cmpf oeq, %49, %65 : vector<64x64xf32>
    "tpu.trace_start"() <{level = 10 : i32, message = "qd,kd->qk"}> : () -> ()
    %cst_19 = arith.constant dense<0.000000e+00> : vector<64x64xf32>
    %67 = tpu.matmul %17, %23, %cst_19 {dimension_numbers = #tpu.dot_dimension_numbers<[1], [1], [0], [0], [0, 0, 1, 0], [], []>} : vector<64x8xf32>, vector<64x8xf32>, vector<64x64xf32> -> vector<64x64xf32>
    %cst_20 = arith.constant -1.000000e+30 : f32
    "tpu.trace_stop"() : () -> ()
    %68 = vector.broadcast %cst_20 : f32 to vector<64x64xf32>
    %69 = arith.select %66, %67, %68 : vector<64x64xi1>, vector<64x64xf32>
    %cst_21 = arith.constant dense<0xFF800000> : vector<64xf32>
    %70 = vector.multi_reduction <maximumf>, %69, %cst_21 [1] : vector<64x64xf32> to vector<64xf32>
    %71 = vector.shape_cast %70 : vector<64xf32> to vector<64x1xf32>
    %72 = vector.broadcast %71 : vector<64x1xf32> to vector<64x64xf32>
    %73 = arith.subf %69, %72 : vector<64x64xf32>
    %74 = math.exp %73 : vector<64x64xf32>
    %cst_22 = arith.constant dense<0.000000e+00> : vector<64xf32>
    %75 = vector.multi_reduction <add>, %74, %cst_22 [1] : vector<64x64xf32> to vector<64xf32>
    %76 = vector.shape_cast %75 : vector<64xf32> to vector<64x1xf32>
    %77 = tpu.reciprocal %76 {approx = true} : vector<64x1xf32> -> vector<64x1xf32>
    %78 = vector.broadcast %77 : vector<64x1xf32> to vector<64x64xf32>
    %79 = arith.mulf %74, %78 : vector<64x64xf32>
    %cst_23 = arith.constant dense<0.000000e+00> : vector<64x8xf32>
    %80 = tpu.matmul %79, %29, %cst_23 {dimension_numbers = #tpu.dot_dimension_numbers<[1], [0], [0], [1], [0, 0, 1, 1], [], []>} : vector<64x64xf32>, vector<64x8xf32>, vector<64x8xf32> -> vector<64x8xf32>
    %81 = vector.extract_strided_slice %80 {offsets = [0, 0], sizes = [16, 8], strides = [1, 1]} : vector<64x8xf32> to vector<16x8xf32>
    %82 = vector.extract_strided_slice %80 {offsets = [16, 0], sizes = [16, 8], strides = [1, 1]} : vector<64x8xf32> to vector<16x8xf32>
    %83 = vector.extract_strided_slice %80 {offsets = [32, 0], sizes = [16, 8], strides = [1, 1]} : vector<64x8xf32> to vector<16x8xf32>
    %84 = vector.extract_strided_slice %80 {offsets = [48, 0], sizes = [16, 8], strides = [1, 1]} : vector<64x8xf32> to vector<16x8xf32>
    %85 = tpu.concatenate %81, %82, %83, %84 in 1 : vector<16x8xf32>, vector<16x8xf32>, vector<16x8xf32>, vector<16x8xf32> -> vector<16x32xf32>
    %c130 = arith.constant 130 : index
    %c0_24 = arith.constant 0 : index
    %86 = vector.load %arg1[%c130, %c0_24] : memref<392x128xf32, #tpu.memory_space<vmem>>, vector<32x32xf32>
    %cst_25 = arith.constant dense<0.000000e+00> : vector<16x32xf32>
    %87 = tpu.matmul %85, %86, %cst_25 {dimension_numbers = #tpu.dot_dimension_numbers<[1], [0], [0], [1], [0, 0, 1, 1], [], []>} : vector<16x32xf32>, vector<32x32xf32>, vector<16x32xf32> -> vector<16x32xf32>
    %c162 = arith.constant 162 : index
    %c0_26 = arith.constant 0 : index
    %88 = vector.load %arg1[%c162, %c0_26] : memref<392x128xf32, #tpu.memory_space<vmem>>, vector<1x32xf32>
    %89 = vector.broadcast %88 : vector<1x32xf32> to vector<16x32xf32>
    %90 = arith.addf %87, %89 : vector<16x32xf32>
    %91 = arith.addf %6, %90 : vector<16x32xf32>
    %cst_27 = arith.constant dense<0.000000e+00> : vector<16xf32>
    %92 = vector.multi_reduction <add>, %91, %cst_27 [1] : vector<16x32xf32> to vector<16xf32>
    %93 = vector.shape_cast %92 : vector<16xf32> to vector<16x1xf32>
    %cst_28 = arith.constant 3.125000e-02 : f32
    %94 = vector.broadcast %cst_28 : f32 to vector<16x1xf32>
    %95 = arith.mulf %93, %94 : vector<16x1xf32>
    %96 = vector.broadcast %95 : vector<16x1xf32> to vector<16x32xf32>
    %97 = arith.subf %91, %96 : vector<16x32xf32>
    %98 = arith.mulf %97, %97 : vector<16x32xf32>
    %cst_29 = arith.constant dense<0.000000e+00> : vector<16xf32>
    %99 = vector.multi_reduction <add>, %98, %cst_29 [1] : vector<16x32xf32> to vector<16xf32>
    %100 = vector.shape_cast %99 : vector<16xf32> to vector<16x1xf32>
    %cst_30 = arith.constant 3.125000e-02 : f32
    %101 = vector.broadcast %cst_30 : f32 to vector<16x1xf32>
    %102 = arith.mulf %100, %101 : vector<16x1xf32>
    %cst_31 = arith.constant 9.99999974E-6 : f32
    %103 = vector.broadcast %cst_31 : f32 to vector<16x1xf32>
    %104 = arith.addf %102, %103 : vector<16x1xf32>
    %105 = math.rsqrt %104 : vector<16x1xf32>
    %106 = vector.broadcast %105 : vector<16x1xf32> to vector<16x32xf32>
    %107 = arith.mulf %97, %106 : vector<16x32xf32>
    %c163 = arith.constant 163 : index
    %c0_32 = arith.constant 0 : index
    %108 = vector.load %arg1[%c163, %c0_32] : memref<392x128xf32, #tpu.memory_space<vmem>>, vector<1x32xf32>
    %109 = vector.broadcast %108 : vector<1x32xf32> to vector<16x32xf32>
    %110 = arith.mulf %107, %109 : vector<16x32xf32>
    %c164 = arith.constant 164 : index
    %c0_33 = arith.constant 0 : index
    %111 = vector.load %arg1[%c164, %c0_33] : memref<392x128xf32, #tpu.memory_space<vmem>>, vector<1x32xf32>
    %112 = vector.broadcast %111 : vector<1x32xf32> to vector<16x32xf32>
    %113 = arith.addf %110, %112 : vector<16x32xf32>
    %114 = tpu.iota {dimensions = array<i32: 0>} : vector<16x16xi32>
    %115 = arith.sitofp %114 : vector<16x16xi32> to vector<16x16xf32>
    %116 = tpu.iota {dimensions = array<i32: 1>} : vector<16x16xi32>
    %117 = arith.sitofp %116 : vector<16x16xi32> to vector<16x16xf32>
    %cst_34 = arith.constant 5.000000e-01 : f32
    %118 = vector.broadcast %cst_34 : f32 to vector<16x16xf32>
    %119 = arith.addf %115, %118 : vector<16x16xf32>
    %cst_35 = arith.constant 5.000000e-01 : f32
    %120 = vector.broadcast %cst_35 : f32 to vector<16x16xf32>
    %121 = arith.mulf %119, %120 : vector<16x16xf32>
    %122 = math.floor %121 : vector<16x16xf32>
    %cst_36 = arith.constant 2.000000e+00 : f32
    %123 = vector.broadcast %cst_36 : f32 to vector<16x16xf32>
    %124 = arith.mulf %122, %123 : vector<16x16xf32>
    %125 = arith.subf %115, %124 : vector<16x16xf32>
    %cst_37 = arith.constant 8.000000e+00 : f32
    %126 = vector.broadcast %cst_37 : f32 to vector<16x16xf32>
    %127 = arith.mulf %125, %126 : vector<16x16xf32>
    %128 = arith.addf %127, %122 : vector<16x16xf32>
    %129 = arith.cmpf oeq, %117, %128 : vector<16x16xf32>
    %cst_38 = arith.constant 1.000000e+00 : f32
    %cst_39 = arith.constant 0.000000e+00 : f32
    %130 = vector.broadcast %cst_38 : f32 to vector<16x16xf32>
    %131 = vector.broadcast %cst_39 : f32 to vector<16x16xf32>
    %132 = arith.select %129, %130, %131 : vector<16x16xi1>, vector<16x16xf32>
    %cst_40 = arith.constant 7.000000e+00 : f32
    %133 = vector.broadcast %cst_40 : f32 to vector<16x16xf32>
    %134 = arith.subf %133, %122 : vector<16x16xf32>
    %cst_41 = arith.constant 2.000000e+00 : f32
    %135 = vector.broadcast %cst_41 : f32 to vector<16x16xf32>
    %136 = arith.mulf %134, %135 : vector<16x16xf32>
    %137 = arith.addf %136, %125 : vector<16x16xf32>
    %138 = arith.cmpf oeq, %117, %137 : vector<16x16xf32>
    %cst_42 = arith.constant 1.000000e+00 : f32
    %cst_43 = arith.constant 0.000000e+00 : f32
    %139 = vector.broadcast %cst_42 : f32 to vector<16x16xf32>
    %140 = vector.broadcast %cst_43 : f32 to vector<16x16xf32>
    %141 = arith.select %138, %139, %140 : vector<16x16xi1>, vector<16x16xf32>
    %cst_44 = arith.constant dense<0.000000e+00> : vector<16x32xf32>
    %142 = tpu.matmul %132, %113, %cst_44 {dimension_numbers = #tpu.dot_dimension_numbers<[1], [0], [0], [1], [0, 0, 1, 1], [], []>} : vector<16x16xf32>, vector<16x32xf32>, vector<16x32xf32> -> vector<16x32xf32>
    %cst_45 = arith.constant dense<0.000000e+00> : vector<16x32xf32>
    %143 = tpu.matmul %141, %142, %cst_45 {dimension_numbers = #tpu.dot_dimension_numbers<[1], [0], [0], [1], [0, 0, 1, 1], [], []>} : vector<16x16xf32>, vector<16x32xf32>, vector<16x32xf32> -> vector<16x32xf32>
    %144 = tpu.concatenate %142, %143 in 1 : vector<16x32xf32>, vector<16x32xf32> -> vector<16x64xf32>
    %c165 = arith.constant 165 : index
    %c0_46 = arith.constant 0 : index
    %145 = vector.load %arg1[%c165, %c0_46] : memref<392x128xf32, #tpu.memory_space<vmem>>, vector<64x128xf32>
    %cst_47 = arith.constant dense<0.000000e+00> : vector<16x128xf32>
    %146 = tpu.matmul %144, %145, %cst_47 {dimension_numbers = #tpu.dot_dimension_numbers<[1], [0], [0], [1], [0, 0, 1, 1], [], []>} : vector<16x64xf32>, vector<64x128xf32>, vector<16x128xf32> -> vector<16x128xf32>
    %c229 = arith.constant 229 : index
    %c0_48 = arith.constant 0 : index
    %147 = vector.load %arg1[%c229, %c0_48] : memref<392x128xf32, #tpu.memory_space<vmem>>, vector<1x128xf32>
    %148 = vector.broadcast %147 : vector<1x128xf32> to vector<16x128xf32>
    %149 = arith.addf %146, %148 : vector<16x128xf32>
    %c230 = arith.constant 230 : index
    %c0_49 = arith.constant 0 : index
    %150 = vector.load %arg1[%c230, %c0_49] : memref<392x128xf32, #tpu.memory_space<vmem>>, vector<32x128xf32>
    %cst_50 = arith.constant 0.000000e+00 : f32
    %151 = vector.broadcast %cst_50 : f32 to vector<2x32xf32>
    %152 = vector.extract_strided_slice %149 {offsets = [0, 0], sizes = [2, 128], strides = [1, 1]} : vector<16x128xf32> to vector<2x128xf32>
    %153 = vector.extract_strided_slice %152 {offsets = [0, 0], sizes = [2, 96], strides = [1, 1]} : vector<2x128xf32> to vector<2x96xf32>
    %154 = arith.negf %153 : vector<2x96xf32>
    %155 = math.exp %154 : vector<2x96xf32>
    %cst_51 = arith.constant 1.000000e+00 : f32
    %156 = vector.broadcast %cst_51 : f32 to vector<2x96xf32>
    %157 = arith.addf %156, %155 : vector<2x96xf32>
    %158 = arith.divf %156, %157 : vector<2x96xf32>
    %159 = vector.extract_strided_slice %152 {offsets = [0, 96], sizes = [2, 32], strides = [1, 1]} : vector<2x128xf32> to vector<2x32xf32>
    %160 = math.tanh %159 : vector<2x32xf32>
    %161 = vector.extract_strided_slice %158 {offsets = [0, 32], sizes = [2, 32], strides = [1, 1]} : vector<2x96xf32> to vector<2x32xf32>
    %162 = arith.mulf %161, %151 : vector<2x32xf32>
    %163 = vector.extract_strided_slice %158 {offsets = [0, 0], sizes = [2, 32], strides = [1, 1]} : vector<2x96xf32> to vector<2x32xf32>
    %164 = arith.mulf %163, %160 : vector<2x32xf32>
    %165 = arith.addf %162, %164 : vector<2x32xf32>
    %166 = vector.extract_strided_slice %158 {offsets = [0, 64], sizes = [2, 32], strides = [1, 1]} : vector<2x96xf32> to vector<2x32xf32>
    %167 = math.tanh %165 : vector<2x32xf32>
    %168 = arith.mulf %166, %167 : vector<2x32xf32>
    %169 = vector.extract_strided_slice %149 {offsets = [2, 0], sizes = [2, 128], strides = [1, 1]} : vector<16x128xf32> to vector<2x128xf32>
    %cst_52 = arith.constant dense<0.000000e+00> : vector<2x128xf32>
    %170 = tpu.matmul %168, %150, %cst_52 {dimension_numbers = #tpu.dot_dimension_numbers<[1], [0], [0], [1], [0, 0, 1, 1], [], []>} : vector<2x32xf32>, vector<32x128xf32>, vector<2x128xf32> -> vector<2x128xf32>
    %171 = arith.addf %169, %170 : vector<2x128xf32>
    %172 = vector.extract_strided_slice %171 {offsets = [0, 0], sizes = [2, 96], strides = [1, 1]} : vector<2x128xf32> to vector<2x96xf32>
    %173 = arith.negf %172 : vector<2x96xf32>
    %174 = math.exp %173 : vector<2x96xf32>
    %cst_53 = arith.constant 1.000000e+00 : f32
    %175 = vector.broadcast %cst_53 : f32 to vector<2x96xf32>
    %176 = arith.addf %175, %174 : vector<2x96xf32>
    %177 = arith.divf %175, %176 : vector<2x96xf32>
    %178 = vector.extract_strided_slice %171 {offsets = [0, 96], sizes = [2, 32], strides = [1, 1]} : vector<2x128xf32> to vector<2x32xf32>
    %179 = math.tanh %178 : vector<2x32xf32>
    %180 = vector.extract_strided_slice %177 {offsets = [0, 32], sizes = [2, 32], strides = [1, 1]} : vector<2x96xf32> to vector<2x32xf32>
    %181 = arith.mulf %180, %165 : vector<2x32xf32>
    %182 = vector.extract_strided_slice %177 {offsets = [0, 0], sizes = [2, 32], strides = [1, 1]} : vector<2x96xf32> to vector<2x32xf32>
    %183 = arith.mulf %182, %179 : vector<2x32xf32>
    %184 = arith.addf %181, %183 : vector<2x32xf32>
    %185 = vector.extract_strided_slice %177 {offsets = [0, 64], sizes = [2, 32], strides = [1, 1]} : vector<2x96xf32> to vector<2x32xf32>
    %186 = math.tanh %184 : vector<2x32xf32>
    %187 = arith.mulf %185, %186 : vector<2x32xf32>
    %188 = vector.extract_strided_slice %149 {offsets = [4, 0], sizes = [2, 128], strides = [1, 1]} : vector<16x128xf32> to vector<2x128xf32>
    %cst_54 = arith.constant dense<0.000000e+00> : vector<2x128xf32>
    %189 = tpu.matmul %187, %150, %cst_54 {dimension_numbers = #tpu.dot_dimension_numbers<[1], [0], [0], [1], [0, 0, 1, 1], [], []>} : vector<2x32xf32>, vector<32x128xf32>, vector<2x128xf32> -> vector<2x128xf32>
    %190 = arith.addf %188, %189 : vector<2x128xf32>
    %191 = vector.extract_strided_slice %190 {offsets = [0, 0], sizes = [2, 96], strides = [1, 1]} : vector<2x128xf32> to vector<2x96xf32>
    %192 = arith.negf %191 : vector<2x96xf32>
    %193 = math.exp %192 : vector<2x96xf32>
    %cst_55 = arith.constant 1.000000e+00 : f32
    %194 = vector.broadcast %cst_55 : f32 to vector<2x96xf32>
    %195 = arith.addf %194, %193 : vector<2x96xf32>
    %196 = arith.divf %194, %195 : vector<2x96xf32>
    %197 = vector.extract_strided_slice %190 {offsets = [0, 96], sizes = [2, 32], strides = [1, 1]} : vector<2x128xf32> to vector<2x32xf32>
    %198 = math.tanh %197 : vector<2x32xf32>
    %199 = vector.extract_strided_slice %196 {offsets = [0, 32], sizes = [2, 32], strides = [1, 1]} : vector<2x96xf32> to vector<2x32xf32>
    %200 = arith.mulf %199, %184 : vector<2x32xf32>
    %201 = vector.extract_strided_slice %196 {offsets = [0, 0], sizes = [2, 32], strides = [1, 1]} : vector<2x96xf32> to vector<2x32xf32>
    %202 = arith.mulf %201, %198 : vector<2x32xf32>
    %203 = arith.addf %200, %202 : vector<2x32xf32>
    %204 = vector.extract_strided_slice %196 {offsets = [0, 64], sizes = [2, 32], strides = [1, 1]} : vector<2x96xf32> to vector<2x32xf32>
    %205 = math.tanh %203 : vector<2x32xf32>
    %206 = arith.mulf %204, %205 : vector<2x32xf32>
    %207 = vector.extract_strided_slice %149 {offsets = [6, 0], sizes = [2, 128], strides = [1, 1]} : vector<16x128xf32> to vector<2x128xf32>
    %cst_56 = arith.constant dense<0.000000e+00> : vector<2x128xf32>
    %208 = tpu.matmul %206, %150, %cst_56 {dimension_numbers = #tpu.dot_dimension_numbers<[1], [0], [0], [1], [0, 0, 1, 1], [], []>} : vector<2x32xf32>, vector<32x128xf32>, vector<2x128xf32> -> vector<2x128xf32>
    %209 = arith.addf %207, %208 : vector<2x128xf32>
    %210 = vector.extract_strided_slice %209 {offsets = [0, 0], sizes = [2, 96], strides = [1, 1]} : vector<2x128xf32> to vector<2x96xf32>
    %211 = arith.negf %210 : vector<2x96xf32>
    %212 = math.exp %211 : vector<2x96xf32>
    %cst_57 = arith.constant 1.000000e+00 : f32
    %213 = vector.broadcast %cst_57 : f32 to vector<2x96xf32>
    %214 = arith.addf %213, %212 : vector<2x96xf32>
    %215 = arith.divf %213, %214 : vector<2x96xf32>
    %216 = vector.extract_strided_slice %209 {offsets = [0, 96], sizes = [2, 32], strides = [1, 1]} : vector<2x128xf32> to vector<2x32xf32>
    %217 = math.tanh %216 : vector<2x32xf32>
    %218 = vector.extract_strided_slice %215 {offsets = [0, 32], sizes = [2, 32], strides = [1, 1]} : vector<2x96xf32> to vector<2x32xf32>
    %219 = arith.mulf %218, %203 : vector<2x32xf32>
    %220 = vector.extract_strided_slice %215 {offsets = [0, 0], sizes = [2, 32], strides = [1, 1]} : vector<2x96xf32> to vector<2x32xf32>
    %221 = arith.mulf %220, %217 : vector<2x32xf32>
    %222 = arith.addf %219, %221 : vector<2x32xf32>
    %223 = vector.extract_strided_slice %215 {offsets = [0, 64], sizes = [2, 32], strides = [1, 1]} : vector<2x96xf32> to vector<2x32xf32>
    %224 = math.tanh %222 : vector<2x32xf32>
    %225 = arith.mulf %223, %224 : vector<2x32xf32>
    %226 = vector.extract_strided_slice %149 {offsets = [8, 0], sizes = [2, 128], strides = [1, 1]} : vector<16x128xf32> to vector<2x128xf32>
    %cst_58 = arith.constant dense<0.000000e+00> : vector<2x128xf32>
    %227 = tpu.matmul %225, %150, %cst_58 {dimension_numbers = #tpu.dot_dimension_numbers<[1], [0], [0], [1], [0, 0, 1, 1], [], []>} : vector<2x32xf32>, vector<32x128xf32>, vector<2x128xf32> -> vector<2x128xf32>
    %228 = arith.addf %226, %227 : vector<2x128xf32>
    %229 = vector.extract_strided_slice %228 {offsets = [0, 0], sizes = [2, 96], strides = [1, 1]} : vector<2x128xf32> to vector<2x96xf32>
    %230 = arith.negf %229 : vector<2x96xf32>
    %231 = math.exp %230 : vector<2x96xf32>
    %cst_59 = arith.constant 1.000000e+00 : f32
    %232 = vector.broadcast %cst_59 : f32 to vector<2x96xf32>
    %233 = arith.addf %232, %231 : vector<2x96xf32>
    %234 = arith.divf %232, %233 : vector<2x96xf32>
    %235 = vector.extract_strided_slice %228 {offsets = [0, 96], sizes = [2, 32], strides = [1, 1]} : vector<2x128xf32> to vector<2x32xf32>
    %236 = math.tanh %235 : vector<2x32xf32>
    %237 = vector.extract_strided_slice %234 {offsets = [0, 32], sizes = [2, 32], strides = [1, 1]} : vector<2x96xf32> to vector<2x32xf32>
    %238 = arith.mulf %237, %222 : vector<2x32xf32>
    %239 = vector.extract_strided_slice %234 {offsets = [0, 0], sizes = [2, 32], strides = [1, 1]} : vector<2x96xf32> to vector<2x32xf32>
    %240 = arith.mulf %239, %236 : vector<2x32xf32>
    %241 = arith.addf %238, %240 : vector<2x32xf32>
    %242 = vector.extract_strided_slice %234 {offsets = [0, 64], sizes = [2, 32], strides = [1, 1]} : vector<2x96xf32> to vector<2x32xf32>
    %243 = math.tanh %241 : vector<2x32xf32>
    %244 = arith.mulf %242, %243 : vector<2x32xf32>
    %245 = vector.extract_strided_slice %149 {offsets = [10, 0], sizes = [2, 128], strides = [1, 1]} : vector<16x128xf32> to vector<2x128xf32>
    %cst_60 = arith.constant dense<0.000000e+00> : vector<2x128xf32>
    %246 = tpu.matmul %244, %150, %cst_60 {dimension_numbers = #tpu.dot_dimension_numbers<[1], [0], [0], [1], [0, 0, 1, 1], [], []>} : vector<2x32xf32>, vector<32x128xf32>, vector<2x128xf32> -> vector<2x128xf32>
    %247 = arith.addf %245, %246 : vector<2x128xf32>
    %248 = vector.extract_strided_slice %247 {offsets = [0, 0], sizes = [2, 96], strides = [1, 1]} : vector<2x128xf32> to vector<2x96xf32>
    %249 = arith.negf %248 : vector<2x96xf32>
    %250 = math.exp %249 : vector<2x96xf32>
    %cst_61 = arith.constant 1.000000e+00 : f32
    %251 = vector.broadcast %cst_61 : f32 to vector<2x96xf32>
    %252 = arith.addf %251, %250 : vector<2x96xf32>
    %253 = arith.divf %251, %252 : vector<2x96xf32>
    %254 = vector.extract_strided_slice %247 {offsets = [0, 96], sizes = [2, 32], strides = [1, 1]} : vector<2x128xf32> to vector<2x32xf32>
    %255 = math.tanh %254 : vector<2x32xf32>
    %256 = vector.extract_strided_slice %253 {offsets = [0, 32], sizes = [2, 32], strides = [1, 1]} : vector<2x96xf32> to vector<2x32xf32>
    %257 = arith.mulf %256, %241 : vector<2x32xf32>
    %258 = vector.extract_strided_slice %253 {offsets = [0, 0], sizes = [2, 32], strides = [1, 1]} : vector<2x96xf32> to vector<2x32xf32>
    %259 = arith.mulf %258, %255 : vector<2x32xf32>
    %260 = arith.addf %257, %259 : vector<2x32xf32>
    %261 = vector.extract_strided_slice %253 {offsets = [0, 64], sizes = [2, 32], strides = [1, 1]} : vector<2x96xf32> to vector<2x32xf32>
    %262 = math.tanh %260 : vector<2x32xf32>
    %263 = arith.mulf %261, %262 : vector<2x32xf32>
    %264 = vector.extract_strided_slice %149 {offsets = [12, 0], sizes = [2, 128], strides = [1, 1]} : vector<16x128xf32> to vector<2x128xf32>
    %cst_62 = arith.constant dense<0.000000e+00> : vector<2x128xf32>
    %265 = tpu.matmul %263, %150, %cst_62 {dimension_numbers = #tpu.dot_dimension_numbers<[1], [0], [0], [1], [0, 0, 1, 1], [], []>} : vector<2x32xf32>, vector<32x128xf32>, vector<2x128xf32> -> vector<2x128xf32>
    %266 = arith.addf %264, %265 : vector<2x128xf32>
    %267 = vector.extract_strided_slice %266 {offsets = [0, 0], sizes = [2, 96], strides = [1, 1]} : vector<2x128xf32> to vector<2x96xf32>
    %268 = arith.negf %267 : vector<2x96xf32>
    %269 = math.exp %268 : vector<2x96xf32>
    %cst_63 = arith.constant 1.000000e+00 : f32
    %270 = vector.broadcast %cst_63 : f32 to vector<2x96xf32>
    %271 = arith.addf %270, %269 : vector<2x96xf32>
    %272 = arith.divf %270, %271 : vector<2x96xf32>
    %273 = vector.extract_strided_slice %266 {offsets = [0, 96], sizes = [2, 32], strides = [1, 1]} : vector<2x128xf32> to vector<2x32xf32>
    %274 = math.tanh %273 : vector<2x32xf32>
    %275 = vector.extract_strided_slice %272 {offsets = [0, 32], sizes = [2, 32], strides = [1, 1]} : vector<2x96xf32> to vector<2x32xf32>
    %276 = arith.mulf %275, %260 : vector<2x32xf32>
    %277 = vector.extract_strided_slice %272 {offsets = [0, 0], sizes = [2, 32], strides = [1, 1]} : vector<2x96xf32> to vector<2x32xf32>
    %278 = arith.mulf %277, %274 : vector<2x32xf32>
    %279 = arith.addf %276, %278 : vector<2x32xf32>
    %280 = vector.extract_strided_slice %272 {offsets = [0, 64], sizes = [2, 32], strides = [1, 1]} : vector<2x96xf32> to vector<2x32xf32>
    %281 = math.tanh %279 : vector<2x32xf32>
    %282 = arith.mulf %280, %281 : vector<2x32xf32>
    %283 = vector.extract_strided_slice %149 {offsets = [14, 0], sizes = [2, 128], strides = [1, 1]} : vector<16x128xf32> to vector<2x128xf32>
    %cst_64 = arith.constant dense<0.000000e+00> : vector<2x128xf32>
    %284 = tpu.matmul %282, %150, %cst_64 {dimension_numbers = #tpu.dot_dimension_numbers<[1], [0], [0], [1], [0, 0, 1, 1], [], []>} : vector<2x32xf32>, vector<32x128xf32>, vector<2x128xf32> -> vector<2x128xf32>
    %285 = arith.addf %283, %284 : vector<2x128xf32>
    %286 = vector.extract_strided_slice %285 {offsets = [0, 0], sizes = [2, 96], strides = [1, 1]} : vector<2x128xf32> to vector<2x96xf32>
    %287 = arith.negf %286 : vector<2x96xf32>
    %288 = math.exp %287 : vector<2x96xf32>
    %cst_65 = arith.constant 1.000000e+00 : f32
    %289 = vector.broadcast %cst_65 : f32 to vector<2x96xf32>
    %290 = arith.addf %289, %288 : vector<2x96xf32>
    %291 = arith.divf %289, %290 : vector<2x96xf32>
    %292 = vector.extract_strided_slice %285 {offsets = [0, 96], sizes = [2, 32], strides = [1, 1]} : vector<2x128xf32> to vector<2x32xf32>
    %293 = math.tanh %292 : vector<2x32xf32>
    %294 = vector.extract_strided_slice %291 {offsets = [0, 32], sizes = [2, 32], strides = [1, 1]} : vector<2x96xf32> to vector<2x32xf32>
    %295 = arith.mulf %294, %279 : vector<2x32xf32>
    %296 = vector.extract_strided_slice %291 {offsets = [0, 0], sizes = [2, 32], strides = [1, 1]} : vector<2x96xf32> to vector<2x32xf32>
    %297 = arith.mulf %296, %293 : vector<2x32xf32>
    %298 = arith.addf %295, %297 : vector<2x32xf32>
    %299 = vector.extract_strided_slice %291 {offsets = [0, 64], sizes = [2, 32], strides = [1, 1]} : vector<2x96xf32> to vector<2x32xf32>
    %300 = math.tanh %298 : vector<2x32xf32>
    %301 = arith.mulf %299, %300 : vector<2x32xf32>
    %302 = tpu.concatenate %168, %187, %206, %225, %244, %263, %282, %301 in 0 : vector<2x32xf32>, vector<2x32xf32>, vector<2x32xf32>, vector<2x32xf32>, vector<2x32xf32>, vector<2x32xf32>, vector<2x32xf32>, vector<2x32xf32> -> vector<16x32xf32>
    %cst_66 = arith.constant dense<0.000000e+00> : vector<16x32xf32>
    %303 = tpu.matmul %141, %302, %cst_66 {dimension_numbers = #tpu.dot_dimension_numbers<[1], [0], [0], [1], [0, 0, 1, 1], [], []>} : vector<16x16xf32>, vector<16x32xf32>, vector<16x32xf32> -> vector<16x32xf32>
    %304 = vector.extract_strided_slice %302 {offsets = [0, 0], sizes = [16, 16], strides = [1, 1]} : vector<16x32xf32> to vector<16x16xf32>
    %305 = vector.extract_strided_slice %303 {offsets = [0, 16], sizes = [16, 16], strides = [1, 1]} : vector<16x32xf32> to vector<16x16xf32>
    %306 = vector.extract_strided_slice %303 {offsets = [0, 0], sizes = [16, 16], strides = [1, 1]} : vector<16x32xf32> to vector<16x16xf32>
    %307 = vector.extract_strided_slice %302 {offsets = [0, 16], sizes = [16, 16], strides = [1, 1]} : vector<16x32xf32> to vector<16x16xf32>
    %308 = tpu.concatenate %304, %305, %306, %307 in 1 : vector<16x16xf32>, vector<16x16xf32>, vector<16x16xf32>, vector<16x16xf32> -> vector<16x64xf32>
    %c262 = arith.constant 262 : index
    %c0_67 = arith.constant 0 : index
    %309 = vector.load %arg1[%c262, %c0_67] : memref<392x128xf32, #tpu.memory_space<vmem>>, vector<64x128xf32>
    %cst_68 = arith.constant dense<0.000000e+00> : vector<16x128xf32>
    %310 = tpu.matmul %308, %309, %cst_68 {dimension_numbers = #tpu.dot_dimension_numbers<[1], [0], [0], [1], [0, 0, 1, 1], [], []>} : vector<16x64xf32>, vector<64x128xf32>, vector<16x128xf32> -> vector<16x128xf32>
    %c326 = arith.constant 326 : index
    %c0_69 = arith.constant 0 : index
    %311 = vector.load %arg1[%c326, %c0_69] : memref<392x128xf32, #tpu.memory_space<vmem>>, vector<1x128xf32>
    %312 = vector.broadcast %311 : vector<1x128xf32> to vector<16x128xf32>
    %313 = arith.addf %310, %312 : vector<16x128xf32>
    %c327 = arith.constant 327 : index
    %c0_70 = arith.constant 0 : index
    %314 = vector.load %arg1[%c327, %c0_70] : memref<392x128xf32, #tpu.memory_space<vmem>>, vector<32x128xf32>
    %cst_71 = arith.constant 0.000000e+00 : f32
    %315 = vector.broadcast %cst_71 : f32 to vector<2x32xf32>
    %316 = vector.extract_strided_slice %313 {offsets = [0, 0], sizes = [2, 128], strides = [1, 1]} : vector<16x128xf32> to vector<2x128xf32>
    %317 = vector.extract_strided_slice %316 {offsets = [0, 0], sizes = [2, 96], strides = [1, 1]} : vector<2x128xf32> to vector<2x96xf32>
    %318 = arith.negf %317 : vector<2x96xf32>
    %319 = math.exp %318 : vector<2x96xf32>
    %cst_72 = arith.constant 1.000000e+00 : f32
    %320 = vector.broadcast %cst_72 : f32 to vector<2x96xf32>
    %321 = arith.addf %320, %319 : vector<2x96xf32>
    %322 = arith.divf %320, %321 : vector<2x96xf32>
    %323 = vector.extract_strided_slice %316 {offsets = [0, 96], sizes = [2, 32], strides = [1, 1]} : vector<2x128xf32> to vector<2x32xf32>
    %324 = math.tanh %323 : vector<2x32xf32>
    %325 = vector.extract_strided_slice %322 {offsets = [0, 32], sizes = [2, 32], strides = [1, 1]} : vector<2x96xf32> to vector<2x32xf32>
    %326 = arith.mulf %325, %315 : vector<2x32xf32>
    %327 = vector.extract_strided_slice %322 {offsets = [0, 0], sizes = [2, 32], strides = [1, 1]} : vector<2x96xf32> to vector<2x32xf32>
    %328 = arith.mulf %327, %324 : vector<2x32xf32>
    %329 = arith.addf %326, %328 : vector<2x32xf32>
    %330 = vector.extract_strided_slice %322 {offsets = [0, 64], sizes = [2, 32], strides = [1, 1]} : vector<2x96xf32> to vector<2x32xf32>
    %331 = math.tanh %329 : vector<2x32xf32>
    %332 = arith.mulf %330, %331 : vector<2x32xf32>
    %333 = vector.extract_strided_slice %313 {offsets = [2, 0], sizes = [2, 128], strides = [1, 1]} : vector<16x128xf32> to vector<2x128xf32>
    %cst_73 = arith.constant dense<0.000000e+00> : vector<2x128xf32>
    %334 = tpu.matmul %332, %314, %cst_73 {dimension_numbers = #tpu.dot_dimension_numbers<[1], [0], [0], [1], [0, 0, 1, 1], [], []>} : vector<2x32xf32>, vector<32x128xf32>, vector<2x128xf32> -> vector<2x128xf32>
    %335 = arith.addf %333, %334 : vector<2x128xf32>
    %336 = vector.extract_strided_slice %335 {offsets = [0, 0], sizes = [2, 96], strides = [1, 1]} : vector<2x128xf32> to vector<2x96xf32>
    %337 = arith.negf %336 : vector<2x96xf32>
    %338 = math.exp %337 : vector<2x96xf32>
    %cst_74 = arith.constant 1.000000e+00 : f32
    %339 = vector.broadcast %cst_74 : f32 to vector<2x96xf32>
    %340 = arith.addf %339, %338 : vector<2x96xf32>
    %341 = arith.divf %339, %340 : vector<2x96xf32>
    %342 = vector.extract_strided_slice %335 {offsets = [0, 96], sizes = [2, 32], strides = [1, 1]} : vector<2x128xf32> to vector<2x32xf32>
    %343 = math.tanh %342 : vector<2x32xf32>
    %344 = vector.extract_strided_slice %341 {offsets = [0, 32], sizes = [2, 32], strides = [1, 1]} : vector<2x96xf32> to vector<2x32xf32>
    %345 = arith.mulf %344, %329 : vector<2x32xf32>
    %346 = vector.extract_strided_slice %341 {offsets = [0, 0], sizes = [2, 32], strides = [1, 1]} : vector<2x96xf32> to vector<2x32xf32>
    %347 = arith.mulf %346, %343 : vector<2x32xf32>
    %348 = arith.addf %345, %347 : vector<2x32xf32>
    %349 = vector.extract_strided_slice %341 {offsets = [0, 64], sizes = [2, 32], strides = [1, 1]} : vector<2x96xf32> to vector<2x32xf32>
    %350 = math.tanh %348 : vector<2x32xf32>
    %351 = arith.mulf %349, %350 : vector<2x32xf32>
    %352 = vector.extract_strided_slice %313 {offsets = [4, 0], sizes = [2, 128], strides = [1, 1]} : vector<16x128xf32> to vector<2x128xf32>
    %cst_75 = arith.constant dense<0.000000e+00> : vector<2x128xf32>
    %353 = tpu.matmul %351, %314, %cst_75 {dimension_numbers = #tpu.dot_dimension_numbers<[1], [0], [0], [1], [0, 0, 1, 1], [], []>} : vector<2x32xf32>, vector<32x128xf32>, vector<2x128xf32> -> vector<2x128xf32>
    %354 = arith.addf %352, %353 : vector<2x128xf32>
    %355 = vector.extract_strided_slice %354 {offsets = [0, 0], sizes = [2, 96], strides = [1, 1]} : vector<2x128xf32> to vector<2x96xf32>
    %356 = arith.negf %355 : vector<2x96xf32>
    %357 = math.exp %356 : vector<2x96xf32>
    %cst_76 = arith.constant 1.000000e+00 : f32
    %358 = vector.broadcast %cst_76 : f32 to vector<2x96xf32>
    %359 = arith.addf %358, %357 : vector<2x96xf32>
    %360 = arith.divf %358, %359 : vector<2x96xf32>
    %361 = vector.extract_strided_slice %354 {offsets = [0, 96], sizes = [2, 32], strides = [1, 1]} : vector<2x128xf32> to vector<2x32xf32>
    %362 = math.tanh %361 : vector<2x32xf32>
    %363 = vector.extract_strided_slice %360 {offsets = [0, 32], sizes = [2, 32], strides = [1, 1]} : vector<2x96xf32> to vector<2x32xf32>
    %364 = arith.mulf %363, %348 : vector<2x32xf32>
    %365 = vector.extract_strided_slice %360 {offsets = [0, 0], sizes = [2, 32], strides = [1, 1]} : vector<2x96xf32> to vector<2x32xf32>
    %366 = arith.mulf %365, %362 : vector<2x32xf32>
    %367 = arith.addf %364, %366 : vector<2x32xf32>
    %368 = vector.extract_strided_slice %360 {offsets = [0, 64], sizes = [2, 32], strides = [1, 1]} : vector<2x96xf32> to vector<2x32xf32>
    %369 = math.tanh %367 : vector<2x32xf32>
    %370 = arith.mulf %368, %369 : vector<2x32xf32>
    %371 = vector.extract_strided_slice %313 {offsets = [6, 0], sizes = [2, 128], strides = [1, 1]} : vector<16x128xf32> to vector<2x128xf32>
    %cst_77 = arith.constant dense<0.000000e+00> : vector<2x128xf32>
    %372 = tpu.matmul %370, %314, %cst_77 {dimension_numbers = #tpu.dot_dimension_numbers<[1], [0], [0], [1], [0, 0, 1, 1], [], []>} : vector<2x32xf32>, vector<32x128xf32>, vector<2x128xf32> -> vector<2x128xf32>
    %373 = arith.addf %371, %372 : vector<2x128xf32>
    %374 = vector.extract_strided_slice %373 {offsets = [0, 0], sizes = [2, 96], strides = [1, 1]} : vector<2x128xf32> to vector<2x96xf32>
    %375 = arith.negf %374 : vector<2x96xf32>
    %376 = math.exp %375 : vector<2x96xf32>
    %cst_78 = arith.constant 1.000000e+00 : f32
    %377 = vector.broadcast %cst_78 : f32 to vector<2x96xf32>
    %378 = arith.addf %377, %376 : vector<2x96xf32>
    %379 = arith.divf %377, %378 : vector<2x96xf32>
    %380 = vector.extract_strided_slice %373 {offsets = [0, 96], sizes = [2, 32], strides = [1, 1]} : vector<2x128xf32> to vector<2x32xf32>
    %381 = math.tanh %380 : vector<2x32xf32>
    %382 = vector.extract_strided_slice %379 {offsets = [0, 32], sizes = [2, 32], strides = [1, 1]} : vector<2x96xf32> to vector<2x32xf32>
    %383 = arith.mulf %382, %367 : vector<2x32xf32>
    %384 = vector.extract_strided_slice %379 {offsets = [0, 0], sizes = [2, 32], strides = [1, 1]} : vector<2x96xf32> to vector<2x32xf32>
    %385 = arith.mulf %384, %381 : vector<2x32xf32>
    %386 = arith.addf %383, %385 : vector<2x32xf32>
    %387 = vector.extract_strided_slice %379 {offsets = [0, 64], sizes = [2, 32], strides = [1, 1]} : vector<2x96xf32> to vector<2x32xf32>
    %388 = math.tanh %386 : vector<2x32xf32>
    %389 = arith.mulf %387, %388 : vector<2x32xf32>
    %390 = vector.extract_strided_slice %313 {offsets = [8, 0], sizes = [2, 128], strides = [1, 1]} : vector<16x128xf32> to vector<2x128xf32>
    %cst_79 = arith.constant dense<0.000000e+00> : vector<2x128xf32>
    %391 = tpu.matmul %389, %314, %cst_79 {dimension_numbers = #tpu.dot_dimension_numbers<[1], [0], [0], [1], [0, 0, 1, 1], [], []>} : vector<2x32xf32>, vector<32x128xf32>, vector<2x128xf32> -> vector<2x128xf32>
    %392 = arith.addf %390, %391 : vector<2x128xf32>
    %393 = vector.extract_strided_slice %392 {offsets = [0, 0], sizes = [2, 96], strides = [1, 1]} : vector<2x128xf32> to vector<2x96xf32>
    %394 = arith.negf %393 : vector<2x96xf32>
    %395 = math.exp %394 : vector<2x96xf32>
    %cst_80 = arith.constant 1.000000e+00 : f32
    %396 = vector.broadcast %cst_80 : f32 to vector<2x96xf32>
    %397 = arith.addf %396, %395 : vector<2x96xf32>
    %398 = arith.divf %396, %397 : vector<2x96xf32>
    %399 = vector.extract_strided_slice %392 {offsets = [0, 96], sizes = [2, 32], strides = [1, 1]} : vector<2x128xf32> to vector<2x32xf32>
    %400 = math.tanh %399 : vector<2x32xf32>
    %401 = vector.extract_strided_slice %398 {offsets = [0, 32], sizes = [2, 32], strides = [1, 1]} : vector<2x96xf32> to vector<2x32xf32>
    %402 = arith.mulf %401, %386 : vector<2x32xf32>
    %403 = vector.extract_strided_slice %398 {offsets = [0, 0], sizes = [2, 32], strides = [1, 1]} : vector<2x96xf32> to vector<2x32xf32>
    %404 = arith.mulf %403, %400 : vector<2x32xf32>
    %405 = arith.addf %402, %404 : vector<2x32xf32>
    %406 = vector.extract_strided_slice %398 {offsets = [0, 64], sizes = [2, 32], strides = [1, 1]} : vector<2x96xf32> to vector<2x32xf32>
    %407 = math.tanh %405 : vector<2x32xf32>
    %408 = arith.mulf %406, %407 : vector<2x32xf32>
    %409 = vector.extract_strided_slice %313 {offsets = [10, 0], sizes = [2, 128], strides = [1, 1]} : vector<16x128xf32> to vector<2x128xf32>
    %cst_81 = arith.constant dense<0.000000e+00> : vector<2x128xf32>
    %410 = tpu.matmul %408, %314, %cst_81 {dimension_numbers = #tpu.dot_dimension_numbers<[1], [0], [0], [1], [0, 0, 1, 1], [], []>} : vector<2x32xf32>, vector<32x128xf32>, vector<2x128xf32> -> vector<2x128xf32>
    %411 = arith.addf %409, %410 : vector<2x128xf32>
    %412 = vector.extract_strided_slice %411 {offsets = [0, 0], sizes = [2, 96], strides = [1, 1]} : vector<2x128xf32> to vector<2x96xf32>
    %413 = arith.negf %412 : vector<2x96xf32>
    %414 = math.exp %413 : vector<2x96xf32>
    %cst_82 = arith.constant 1.000000e+00 : f32
    %415 = vector.broadcast %cst_82 : f32 to vector<2x96xf32>
    %416 = arith.addf %415, %414 : vector<2x96xf32>
    %417 = arith.divf %415, %416 : vector<2x96xf32>
    %418 = vector.extract_strided_slice %411 {offsets = [0, 96], sizes = [2, 32], strides = [1, 1]} : vector<2x128xf32> to vector<2x32xf32>
    %419 = math.tanh %418 : vector<2x32xf32>
    %420 = vector.extract_strided_slice %417 {offsets = [0, 32], sizes = [2, 32], strides = [1, 1]} : vector<2x96xf32> to vector<2x32xf32>
    %421 = arith.mulf %420, %405 : vector<2x32xf32>
    %422 = vector.extract_strided_slice %417 {offsets = [0, 0], sizes = [2, 32], strides = [1, 1]} : vector<2x96xf32> to vector<2x32xf32>
    %423 = arith.mulf %422, %419 : vector<2x32xf32>
    %424 = arith.addf %421, %423 : vector<2x32xf32>
    %425 = vector.extract_strided_slice %417 {offsets = [0, 64], sizes = [2, 32], strides = [1, 1]} : vector<2x96xf32> to vector<2x32xf32>
    %426 = math.tanh %424 : vector<2x32xf32>
    %427 = arith.mulf %425, %426 : vector<2x32xf32>
    %428 = vector.extract_strided_slice %313 {offsets = [12, 0], sizes = [2, 128], strides = [1, 1]} : vector<16x128xf32> to vector<2x128xf32>
    %cst_83 = arith.constant dense<0.000000e+00> : vector<2x128xf32>
    %429 = tpu.matmul %427, %314, %cst_83 {dimension_numbers = #tpu.dot_dimension_numbers<[1], [0], [0], [1], [0, 0, 1, 1], [], []>} : vector<2x32xf32>, vector<32x128xf32>, vector<2x128xf32> -> vector<2x128xf32>
    %430 = arith.addf %428, %429 : vector<2x128xf32>
    %431 = vector.extract_strided_slice %430 {offsets = [0, 0], sizes = [2, 96], strides = [1, 1]} : vector<2x128xf32> to vector<2x96xf32>
    %432 = arith.negf %431 : vector<2x96xf32>
    %433 = math.exp %432 : vector<2x96xf32>
    %cst_84 = arith.constant 1.000000e+00 : f32
    %434 = vector.broadcast %cst_84 : f32 to vector<2x96xf32>
    %435 = arith.addf %434, %433 : vector<2x96xf32>
    %436 = arith.divf %434, %435 : vector<2x96xf32>
    %437 = vector.extract_strided_slice %430 {offsets = [0, 96], sizes = [2, 32], strides = [1, 1]} : vector<2x128xf32> to vector<2x32xf32>
    %438 = math.tanh %437 : vector<2x32xf32>
    %439 = vector.extract_strided_slice %436 {offsets = [0, 32], sizes = [2, 32], strides = [1, 1]} : vector<2x96xf32> to vector<2x32xf32>
    %440 = arith.mulf %439, %424 : vector<2x32xf32>
    %441 = vector.extract_strided_slice %436 {offsets = [0, 0], sizes = [2, 32], strides = [1, 1]} : vector<2x96xf32> to vector<2x32xf32>
    %442 = arith.mulf %441, %438 : vector<2x32xf32>
    %443 = arith.addf %440, %442 : vector<2x32xf32>
    %444 = vector.extract_strided_slice %436 {offsets = [0, 64], sizes = [2, 32], strides = [1, 1]} : vector<2x96xf32> to vector<2x32xf32>
    %445 = math.tanh %443 : vector<2x32xf32>
    %446 = arith.mulf %444, %445 : vector<2x32xf32>
    %447 = vector.extract_strided_slice %313 {offsets = [14, 0], sizes = [2, 128], strides = [1, 1]} : vector<16x128xf32> to vector<2x128xf32>
    %cst_85 = arith.constant dense<0.000000e+00> : vector<2x128xf32>
    %448 = tpu.matmul %446, %314, %cst_85 {dimension_numbers = #tpu.dot_dimension_numbers<[1], [0], [0], [1], [0, 0, 1, 1], [], []>} : vector<2x32xf32>, vector<32x128xf32>, vector<2x128xf32> -> vector<2x128xf32>
    %449 = arith.addf %447, %448 : vector<2x128xf32>
    %450 = vector.extract_strided_slice %449 {offsets = [0, 0], sizes = [2, 96], strides = [1, 1]} : vector<2x128xf32> to vector<2x96xf32>
    %451 = arith.negf %450 : vector<2x96xf32>
    %452 = math.exp %451 : vector<2x96xf32>
    %cst_86 = arith.constant 1.000000e+00 : f32
    %453 = vector.broadcast %cst_86 : f32 to vector<2x96xf32>
    %454 = arith.addf %453, %452 : vector<2x96xf32>
    %455 = arith.divf %453, %454 : vector<2x96xf32>
    %456 = vector.extract_strided_slice %449 {offsets = [0, 96], sizes = [2, 32], strides = [1, 1]} : vector<2x128xf32> to vector<2x32xf32>
    %457 = math.tanh %456 : vector<2x32xf32>
    %458 = vector.extract_strided_slice %455 {offsets = [0, 32], sizes = [2, 32], strides = [1, 1]} : vector<2x96xf32> to vector<2x32xf32>
    %459 = arith.mulf %458, %443 : vector<2x32xf32>
    %460 = vector.extract_strided_slice %455 {offsets = [0, 0], sizes = [2, 32], strides = [1, 1]} : vector<2x96xf32> to vector<2x32xf32>
    %461 = arith.mulf %460, %457 : vector<2x32xf32>
    %462 = arith.addf %459, %461 : vector<2x32xf32>
    %463 = vector.extract_strided_slice %455 {offsets = [0, 64], sizes = [2, 32], strides = [1, 1]} : vector<2x96xf32> to vector<2x32xf32>
    %464 = math.tanh %462 : vector<2x32xf32>
    %465 = arith.mulf %463, %464 : vector<2x32xf32>
    %466 = arith.addf %332, %351 : vector<2x32xf32>
    %467 = arith.addf %466, %370 : vector<2x32xf32>
    %468 = arith.addf %467, %389 : vector<2x32xf32>
    %469 = arith.addf %468, %408 : vector<2x32xf32>
    %470 = arith.addf %469, %427 : vector<2x32xf32>
    %471 = arith.addf %470, %446 : vector<2x32xf32>
    %472 = arith.addf %471, %465 : vector<2x32xf32>
    %cst_87 = arith.constant 1.250000e-01 : f32
    %473 = vector.broadcast %cst_87 : f32 to vector<2x32xf32>
    %474 = arith.mulf %472, %473 : vector<2x32xf32>
    %c359 = arith.constant 359 : index
    %c0_88 = arith.constant 0 : index
    %475 = vector.load %arg1[%c359, %c0_88] : memref<392x128xf32, #tpu.memory_space<vmem>>, vector<32x5xf32>
    %cst_89 = arith.constant dense<0.000000e+00> : vector<2x5xf32>
    %476 = tpu.matmul %474, %475, %cst_89 {dimension_numbers = #tpu.dot_dimension_numbers<[1], [0], [0], [1], [0, 0, 1, 1], [], []>} : vector<2x32xf32>, vector<32x5xf32>, vector<2x5xf32> -> vector<2x5xf32>
    %c391 = arith.constant 391 : index
    %c0_90 = arith.constant 0 : index
    %477 = vector.load %arg1[%c391, %c0_90] : memref<392x128xf32, #tpu.memory_space<vmem>>, vector<1x5xf32>
    %478 = vector.broadcast %477 : vector<1x5xf32> to vector<2x5xf32>
    %479 = arith.addf %476, %478 : vector<2x5xf32>
    %480 = arith.negf %479 : vector<2x5xf32>
    %481 = math.exp %480 : vector<2x5xf32>
    %cst_91 = arith.constant 1.000000e+00 : f32
    %482 = vector.broadcast %cst_91 : f32 to vector<2x5xf32>
    %483 = arith.addf %482, %481 : vector<2x5xf32>
    %484 = arith.divf %482, %483 : vector<2x5xf32>
    %c0_92 = arith.constant 0 : index
    %c0_93 = arith.constant 0 : index
    %485 = vector.load %arg2[%c0_92, %c0_93] : memref<2x5xf32, #tpu.memory_space<vmem>>, vector<2x5xf32>
    tpu.vector_store %arg2[%c0_92, %c0_93], %484 {strides = array<i32>} : memref<2x5xf32, #tpu.memory_space<vmem>>, vector<2x5xf32>,
    return
  }
}

</mosaic_0001>

<bundles_post_ra>
// kernel: mha_forward.1
= control target key start
LH: loop header
LB: loop body
LE: loop exit
PB: predicated region body
PF: predicated region fallthrough
CT: control target
= control target key end

     0   :  { %7 = vsyncpa [#allocation3], 0  ;;  %s4612_s0 = inlined_call_operand.vmem [shape: f32[16,32], index: 0, kind: input, shape index: {}]   ;;  %s4613_s1 = inlined_call_operand.hbm [shape: f32[392,128], index: 1, kind: input, shape index: {}]   ;;  %s4614_s2 = inlined_call_operand.hbm [shape: f32[2,5], index: 2, kind: output, shape index: {}]  }
   0x1   :  { %8 = vsyncpa [#allocation4], 0  ;;  %s4143_s9 = smov [#allocation2]   ;;  %s4095_s13 = scalar_lea.hbm %s4613_s1, 6272 }
   0x2   :  { %s16_s10 = sshll.u32 %s4143_s9, 4  ;;  %p4096_p0 = scmp.ne.s32.totalorder %s4613_s1, %s4095_s13  ;;  %s17_s10 = int_to_ptr.vmem [resolvable:$true] %s16_s10 }
   0x3   :  { %p4099_p1 = scmp.lt.u32.totalorder %s4095_s13, %s4613_s1 }
   0x5   :  { %p4101_p2 = pnand %p4099_p1, %p4096_p0 }
   0x7   :  { %4104 = shalt.err (!%p4101_p2)
}
   0x8   :  { %s4105_s18 = scalar_lea.vmem %s17_s10, 6272  ;;  %p4110_p4 = scmp.lt.s32.totalorder %s17_s10, %s17_s10 }
   0x9   :  { %p4106_p3 = scmp.ne.s32.totalorder %s17_s10, %s4105_s18  ;;  %p4111_p5 = scmp.lt.s32.totalorder %s4105_s18, %s4105_s18 }
   0xb   :  { %p4112_p6 = por %p4111_p5, %p4110_p4 }
   0xd   :  { %p4113_p7 = pnand %p4112_p6, %p4106_p3 }
   0xf   :  { %4116 = shalt.err (!%p4113_p7)
}
  0x10   :  { %s4144_s19 = smov 128   ;;  %s4145_s20 = smov 8  }
  0x11   :  { %22 = dma.hbm_to_vmem [thread:$0]  %s4613_s1, 6272, %s17_s10, [#allocation3], %s4144_s19, %s4144_s19, %s4145_s20  }
  0x12   :  { %4139 = dma.done.wait [#allocation3], 6272  }
  0x13   :  { %4140 = vsyncadd [#allocation3], 4294961024  ;;  %vm37_vm0 = vcmask 261120   ;;  %v28_v0 = vld [vmem:[#allocation2] sm:$0xff]  ;;  %v29_v1 = vld [vmem:[#allocation2 + $0x8] sm:$0xff]  ;;  %vm136_vm1 = vcmask 785408   ;;  %v232_v63 = vlaneseq }
  0x14   :  { %v30_v2 = vld [vmem:[#allocation2 + $0x10] sm:$0xff]  ;;  %v3658_v3 = vpack.c.bf16 %v29_v1, %v28_v0  ;;  %v31_v4 = vld [vmem:[#allocation2 + $0x18] sm:$0xff]  ;;  %v26_v5 = vld [vmem:[%s4612_s0] sm:$0xff]  ;;  %vm366_vm2 = vcmask 64512   ;;  %s4147_s26 = smov 120   ;;  %s4148_s27 = smov 104  }
  0x15   :  { %v3662_v6 = vpack.c.bf16 %v31_v4, %v30_v2  ;;  %3337 = vmatprep.mubr.msk.f32.mxu0 %vm37_vm0, %v26_v5  ;;  %v119_v7 = vld [vmem:[#allocation2 + $0x21] sm:$0xff]  ;;  %v120_v8 = vld [vmem:[#allocation2 + $0x29] sm:$0xff]  ;;  %v121_v9 = vld [vmem:[#allocation2 + $0x31] sm:$0xff]  ;;  %s4149_s28 = smov 96   ;;  %v233_v0 = vshrl.u32 %v232_v63, 7  ;;  %v250_v2 = vand.u32 127, %v232_v63 }
  0x16   :  { %3659 = vmatprep.subr.bf16.mxu0 %v3658_v3  ;;  %v3666_v10 = vpack.c.bf16 %v120_v8, %v119_v7  ;;  %v122_v11 = vld [vmem:[#allocation2 + $0x39] sm:$0xff]  ;;  %v123_v13 = vld [vmem:[#allocation2 + $0x41] sm:$0xff]  ;;  %v124_v14 = vld [vmem:[#allocation2 + $0x49] sm:$0xff]  ;;  %vm512_vm6 = vcmask 523264   ;;  %s4150_s29 = smov 64   ;;  %s4151_s30 = smov 16  }
  0x17   :  { %3661 = vmatpush3.bf16.msra.mxu0 %v3658_v3  ;;  %v3670_v12 = vpack.c.bf16 %v122_v11, %v121_v9  ;;  %v3674_v15 = vpack.c.bf16 %v124_v14, %v123_v13  ;;  %v27_v16 = vld [vmem:[%s4612_s0 + $0x8] sm:$0xff]  ;;  %v125_v17 = vld [vmem:[#allocation2 + $0x51] sm:$0xff]  ;;  %v126_v18 = vld [vmem:[#allocation2 + $0x59] sm:$0xff]  ;;  %s4146_s0 = smov 112   ;;  %v234_v1 = vadd.s32 8, %v233_v0  ;;  %v4248_v4 = vcvt.s32.f32 %v250_v2  ;;  %s4152_s3 = smov 24  }
  0x18   :  { %3663 = vmatprep.subr.bf16.mxu0 %v3662_v6  ;;  %3667 = vmatprep.subr.bf16.mxu1 %v3666_v10  ;;  %v3678_v19 = vpack.c.bf16 %v126_v18, %v125_v17  ;;  %v127_v20 = vld [vmem:[#allocation2 + $0x61] sm:$0xff]  ;;  %v128_v21 = vld [vmem:[#allocation2 + $0x69] sm:$0xff]  ;;  %v129_v23 = vld [vmem:[#allocation2 + $0x71] sm:$0xff]  ;;  %v4250_v5 = vcvt.s32.f32 %v233_v0  ;;  %v236_v7 = vadd.s32 24, %v233_v0  ;;  %v238_v14 = vadd.s32 40, %v233_v0  ;;  %s4154_s4 = smov 32  }
  0x19   :  { %3669 = vmatpush3.bf16.msra.mxu1 %v3666_v10  ;;  %v3682_v22 = vpack.c.bf16 %v128_v21, %v127_v20  ;;  %v130_v24 = vld [vmem:[#allocation2 + $0x79] sm:$0xff]  ;;  %v3087_v31 = vld [vmem:[#allocation2 + $0x81] ss:$0 sm:$0xff]  ;;  %vm4219_vm3 = vmpackc.low %vm366_vm2, %vm366_vm2  ;;  %v4246_v3 = vcvt.s32.f32 %v234_v1  ;;  %v332_v9 = vadd.f32 0.5, %v4248_v4  ;;  %v239_v20 = vadd.s32 48, %v233_v0  ;;  %s4157_s5 = smov [#allocation5]  }
  0x1a   :  { %3671 = vmatprep.subr.bf16.mxu1 %v3670_v12  ;;  %v3686_v25 = vpack.c.bf16 %v130_v24, %v129_v23  ;;  %v3084_v26 = vld [vmem:[#allocation2 + $0x20] ss:$0 sm:$0xff]  ;;  %v4257_v10 = vadd.f32 0.5, %v4250_v5  ;;  %v244_v13 = vcvt.s32.f32 %v236_v7  ;;  %v240_v23 = vadd.s32 56, %v233_v0  ;;  %s3075_s6 = sshll.u32 %s4157_s5, 4  ;;  %s3076_s6 = int_to_ptr.vmem [resolvable:$true] %s3075_s6 }
  0x1b   :  { %3665 = vmatpush3.bf16.msra.mxu0 %v3662_v6  ;;  %v235_v6 = vadd.s32 16, %v233_v0  ;;  %v4253_v8 = vadd.f32 0.5, %v4246_v3  ;;  %vm780_vm13 = vcmask 130048   ;;  %vm783_vm14 = vcmask 195584   ;;  %s4117_s7 = scalar_lea.vmem %s3076_s6, 32  ;;  %p4122_p9 = scmp.lt.s32.totalorder %s3076_s6, %s3076_s6 }
  0x1c   :  { %v260_v17 = vmul.f32 0.0625, %v4257_v10  ;;  %v255_v21 = vadd.f32 0.5, %v244_v13  ;;  %p4118_p8 = scmp.ne.s32.totalorder %s3076_s6, %s4117_s7  ;;  %p4123_p10 = scmp.lt.s32.totalorder %s4117_s7, %s4117_s7 }
  0x1d   :  { %3673 = vmatpush3.bf16.msra.mxu1 %v3670_v12  ;;  %v243_v11 = vcvt.s32.f32 %v235_v6  ;;  %v237_v12 = vadd.s32 32, %v233_v0 }
  0x1e   :  { %3338 = vmatmul.mubr.msk.f32.vlgmr.msra.gmra.mrb[0].mxu0 %vm37_vm0, %v27_v16  ;;  %3675 = vmatprep.subr.bf16.mxu1 %v3674_v15  ;;  %v333_v16 = vmul.f32 0.0625, %v332_v9  ;;  %p4124_p11 = por %p4123_p10, %p4122_p9 }
  0x1f   :  { %v254_v18 = vadd.f32 0.5, %v243_v11 }
  0x20   :  { %p4125_p12 = pnand %p4124_p11, %p4118_p8 }
  0x21   :  { %3677 = vmatpush3.bf16.msra.mxu1 %v3674_v15  ;;  %v261_v15 = vmul.f32 0.0625, %v4253_v8 }
  0x22   :  { %3679 = vmatprep.subr.bf16.mxu1 %v3678_v19 }
  0x23   :  { %v269_v24 = vfloor.f32 %v261_v15 }
  0x25   :  { %3681 = vmatpush3.bf16.msra.mxu1 %v3678_v19  ;;  %v245_v19 = vcvt.s32.f32 %v237_v12 }
  0x26   :  { %3683 = vmatprep.subr.bf16.mxu1 %v3682_v22 }
  0x29   :  { %3685 = vmatpush3.bf16.msra.mxu1 %v3682_v22  ;;  %v246_v22 = vcvt.s32.f32 %v238_v14 }
  0x2a   :  { %3687 = vmatprep.subr.bf16.mxu1 %v3686_v25 }
  0x2d   :  { %3689 = vmatpush3.bf16.msra.mxu1 %v3686_v25  ;;  %v334_v25 = vfloor.f32 %v333_v16 }
  0xf1   :  { %v3339_v27 = vpop.f32.mrb[0].mxu0 }
  0xf2   :  { %v110_v28 = vpop.f32.mrb[1].mxu0  ;;  %v4196_v30 = vadd.f32 %v3339_v27, %v3084_v26  ;;  %v262_v27 = vmul.f32 0.0625, %v254_v18 }
  0xf3   :  { %v4194_v29 = vadd.f32 %v3084_v26, %v110_v28  ;;  %v268_v26 = vfloor.f32 %v260_v17  ;;  %v256_v28 = vadd.f32 0.5, %v245_v19 }
  0xf5   :  { %3364 = vmatprep.mubr.msk.f32.mxu1 %vm136_vm1, %v4194_v29 }
  0xf6   :  { %3365 = vmatmul.mubr.msk.f32.vlgmr.msra.gmra.mrb[0].mxu1 %vm136_vm1, %v4196_v30 }
 0x1c9   :  { %v3366_v32 = vpop.f32.mrb[0].mxu1 }
 0x1ca   :  { %v209_v33 = vpop.f32.mrb[1].mxu1  ;;  %v215_v35 = vadd.f32 %v3366_v32, %v3087_v31  ;;  %v263_v32 = vmul.f32 0.0625, %v255_v21 }
 0x1cb   :  { %v210_v34 = vadd.f32 %v3087_v31, %v209_v33  ;;  %v247_v31 = vcvt.s32.f32 %v239_v20  ;;  %v257_v33 = vadd.f32 0.5, %v246_v22 }
 0x1cd   :  { %224 = vrot.lane.b32.xlu1 %v210_v34, %s4146_s0  ;;  %220 = vrot.lane.b32.xlu0 %v210_v34, %s4147_s26  ;;  %v4201_v36 = vpack.i.bf16 %v215_v35, %v210_v34 }
 0x1ce   :  { %3383 = vmatprep.mubr.msk.f32.mxu0 %vm366_vm2, %v210_v34 }
 0x1d1   :  { %226 = vrot.lane.b32.xlu1 %v215_v35, %s4146_s0  ;;  %222 = vrot.lane.b32.xlu0 %v215_v35, %s4147_s26 }
 0x1d5   :  { %230 = vrot.lane.b32.xlu1 %v215_v35, %s4148_s27  ;;  %228 = vrot.lane.b32.xlu0 %v210_v34, %s4148_s27  ;;  %v248_v34 = vcvt.s32.f32 %v240_v23 }
 0x1d9   :  { %3888 = vrot.lane.b32.xlu0 %v4201_v36, %s4149_s28 }
 0x23f   :  { %v225_v37 = vpop.permute.xlu1 %224  ;;  %v221_v38 = vpop.permute.xlu0 %220 }
 0x243   :  { %v227_v39 = vpop.permute.xlu1 %226  ;;  %v223_v40 = vpop.permute.xlu0 %222 }
 0x244   :  { %v4205_v41 = vpack.i.bf16 %v227_v39, %v225_v37  ;;  %v4207_v42 = vpack.i.bf16 %v223_v40, %v221_v38 }
 0x246   :  { %3898 = vrot.lane.b32.xlu0 %v4205_v41, %s4149_s28  ;;  %3893 = vrot.lane.b32.xlu1 %v4207_v42, %s4149_s28 }
 0x247   :  { %v231_v43 = vpop.permute.xlu1 %230  ;;  %v229_v44 = vpop.permute.xlu0 %228 }
 0x248   :  { %v4213_v45 = vpack.i.bf16 %v231_v43, %v229_v44 }
 0x24a   :  { %3903 = vrot.lane.b32.xlu1 %v4213_v45, %s4149_s28 }
 0x24b   :  { %v3889_v46 = vpop.permute.xlu0 %3888 }
 0x24c   :  { %v3891_v47 = vunpack.i.h.bf16 %v3889_v46  ;;  %v3890_v48 = vunpack.i.l.bf16 %v3889_v46  ;;  %v265_v46 = vmul.f32 0.0625, %v257_v33 }
 0x24e   :  { %v3690_v50 = vpack.c.bf16 %v3891_v47, %v3890_v48  ;;  %v259_v47 = vadd.f32 0.5, %v248_v34 }
 0x250   :  { %3692 = vmatprep.subr.msk.bf16.mxu0 %vm4219_vm3, %v3690_v50 }
 0x251   :  { %3695 = vmatpush3.bf16.xpose.msk.msra.mxu0 %vm4219_vm3, %v3690_v50 }
 0x2b8   :  { %v3894_v51 = vpop.permute.xlu1 %3893  ;;  %v3899_v52 = vpop.permute.xlu0 %3898 }
 0x2b9   :  { %v3896_v53 = vunpack.i.h.bf16 %v3894_v51  ;;  %v3895_v54 = vunpack.i.l.bf16 %v3894_v51  ;;  %v3901_v55 = vunpack.i.h.bf16 %v3899_v52  ;;  %v3900_v56 = vunpack.i.l.bf16 %v3899_v52 }
 0x2bb   :  { %v3696_v57 = vpack.c.bf16 %v3896_v53, %v3895_v54  ;;  %v3702_v58 = vpack.c.bf16 %v3901_v55, %v3900_v56  ;;  %v273_v55 = vfloor.f32 %v265_v46  ;;  %v267_v56 = vmul.f32 0.0625, %v259_v47 }
 0x2bc   :  { %v3904_v59 = vpop.permute.xlu1 %3903 }
 0x2bd   :  { %3698 = vmatprep.subr.msk.bf16.mxu0 %vm4219_vm3, %v3696_v57  ;;  %v3906_v60 = vunpack.i.h.bf16 %v3904_v59  ;;  %v3905_v61 = vunpack.i.l.bf16 %v3904_v59  ;;  %v281_v0 = vmul.f32 16.0, %v273_v55  ;;  %v275_v1 = vfloor.f32 %v267_v56 }
 0x2be   :  { %3701 = vmatpush3.bf16.xpose.msk.msra.mxu0 %vm4219_vm3, %v3696_v57 }
 0x2bf   :  { %3704 = vmatprep.subr.msk.bf16.mxu0 %vm4219_vm3, %v3702_v58  ;;  %v3708_v62 = vpack.c.bf16 %v3906_v60, %v3905_v61  ;;  %v289_v16 = vsub.f32 %v246_v22, %v281_v0  ;;  %v283_v17 = vmul.f32 16.0, %v275_v1 }
 0x2c6   :  { %3707 = vmatpush3.bf16.xpose.msk.msra.mxu0 %vm4219_vm3, %v3702_v58 }
 0x2c7   :  { %3710 = vmatprep.subr.msk.bf16.mxu0 %vm4219_vm3, %v3708_v62 }
 0x2ce   :  { %3713 = vmatpush3.bf16.xpose.msk.msra.mxu0 %vm4219_vm3, %v3708_v62 }
 0x2d5   :  { %3384 = vmatmul.mubr.msk.f32.vlgmr.msra.gmra.mrb[2].mxu0 %vm366_vm2, %v215_v35  ;;  %v277_v35 = vmul.f32 16.0, %v269_v24 }
 0x2d6   :  { %3386 = vmatprep.mubr.msk.f32.mxu0 %vm366_vm2, %v221_v38  ;;  %v276_v38 = vmul.f32 16.0, %v268_v26 }
 0x2d7   :  { %v285_v48 = vsub.f32 %v4246_v3, %v277_v35 }
 0x2d8   :  { %v284_v50 = vsub.f32 %v4250_v5, %v276_v38 }
 0x2d9   :  { %3387 = vmatmul.mubr.msk.f32.gmra.mrb[4].mxu0 %vm366_vm2, %v223_v40  ;;  %v264_v40 = vmul.f32 0.0625, %v256_v28  ;;  %v293_v57 = vmul.f32 4.0, %v285_v48 }
 0x2da   :  { %3389 = vmatprep.mubr.msk.f32.mxu0 %vm366_vm2, %v225_v37  ;;  %v335_v37 = vmul.f32 16.0, %v334_v25  ;;  %v292_v59 = vmul.f32 4.0, %v284_v50 }
 0x2db   :  { %v272_v52 = vfloor.f32 %v264_v40  ;;  %v301_v2 = vadd.f32 %v293_v57, %v269_v24 }
 0x2dc   :  { %v336_v49 = vsub.f32 %v4248_v4, %v335_v37  ;;  %v300_v7 = vadd.f32 %v292_v59, %v268_v26 }
 0x2dd   :  { %3390 = vmatmul.mubr.msk.f32.gmra.mrb[6].mxu0 %vm366_vm2, %v227_v39  ;;  %v270_v39 = vfloor.f32 %v262_v27  ;;  %v280_v61 = vmul.f32 16.0, %v272_v52  ;;  %v309_v18 = vadd.f32 0.5, %v301_v2 }
 0x2de   :  { %3392 = vmatprep.mubr.msk.f32.mxu0 %vm366_vm2, %v229_v44  ;;  %v271_v44 = vfloor.f32 %v263_v32  ;;  %v337_v58 = vmul.f32 4.0, %v336_v49  ;;  %v308_v21 = vadd.f32 0.5, %v300_v7  ;;  %v297_v32 = vmul.f32 4.0, %v289_v16 }
 0x2df   :  { %v278_v51 = vmul.f32 16.0, %v270_v39  ;;  %v288_v12 = vsub.f32 %v245_v19, %v280_v61  ;;  %v317_v33 = vmul.f32 0.125, %v309_v18 }
 0x2e0   :  { %v279_v54 = vmul.f32 16.0, %v271_v44  ;;  %v338_v6 = vadd.f32 %v337_v58, %v334_v25  ;;  %v316_v24 = vmul.f32 0.125, %v308_v21  ;;  %v305_v38 = vadd.f32 %v297_v32, %v273_v55 }
 0x2e1   :  { %3393 = vmatmul.mubr.msk.f32.gmra.mrb[8].mxu0 %vm366_vm2, %v231_v43  ;;  %v258_v43 = vadd.f32 0.5, %v247_v31  ;;  %v286_v60 = vsub.f32 %v243_v11, %v278_v51  ;;  %v296_v27 = vmul.f32 4.0, %v288_v12  ;;  %v325_v22 = vfloor.f32 %v317_v33 }
 0x2e2   :  { %v287_v63 = vsub.f32 %v244_v13, %v279_v54  ;;  %v339_v20 = vadd.f32 0.5, %v338_v6  ;;  %v291_v13 = vsub.f32 %v248_v34, %v283_v17  ;;  %v324_v46 = vfloor.f32 %v316_v24 }
 0x2e3   :  { %v266_v53 = vmul.f32 0.0625, %v258_v43  ;;  %v294_v9 = vmul.f32 4.0, %v286_v60  ;;  %v304_v26 = vadd.f32 %v296_v27, %v272_v52 }
 0x2e4   :  { %v295_v15 = vmul.f32 4.0, %v287_v63  ;;  %v340_v35 = vmul.f32 0.125, %v339_v20  ;;  %v299_v40 = vmul.f32 4.0, %v291_v13 }
 0x2e5   :  { %v274_v62 = vfloor.f32 %v266_v53  ;;  %v302_v23 = vadd.f32 %v294_v9, %v270_v39  ;;  %v312_v48 = vadd.f32 0.5, %v304_v26 }
 0x2e6   :  { %v303_v28 = vadd.f32 %v295_v15, %v271_v44  ;;  %v341_v43 = vfloor.f32 %v340_v35  ;;  %v307_v44 = vadd.f32 %v299_v40, %v275_v1 }
 0x2e7   :  { %v282_v14 = vmul.f32 16.0, %v274_v62  ;;  %v310_v25 = vadd.f32 0.5, %v302_v23  ;;  %v320_v50 = vmul.f32 0.125, %v312_v48 }
 0x2e8   :  { %v311_v19 = vadd.f32 0.5, %v303_v28  ;;  %vm343_vm4 = vcmp.eq.f32.partialorder %v325_v22, %v341_v43  ;;  %vm342_vm5 = vcmp.eq.f32.partialorder %v324_v46, %v341_v43  ;;  %v315_v57 = vadd.f32 0.5, %v307_v44 }
 0x2e9   :  { %v290_v11 = vsub.f32 %v247_v31, %v282_v14  ;;  %v318_v47 = vmul.f32 0.125, %v310_v25  ;;  %v313_v31 = vadd.f32 0.5, %v305_v38  ;;  %v328_v61 = vfloor.f32 %v320_v50 }
 0x2ea   :  { %v319_v49 = vmul.f32 0.125, %v311_v19  ;;  %v323_v2 = vmul.f32 0.125, %v315_v57 }
 0x2eb   :  { %v298_v37 = vmul.f32 4.0, %v290_v11  ;;  %v326_v34 = vfloor.f32 %v318_v47  ;;  %v321_v56 = vmul.f32 0.125, %v313_v31  ;;  %vm346_vm9 = vcmp.eq.f32.partialorder %v328_v61, %v341_v43 }
 0x2ec   :  { %v327_v55 = vfloor.f32 %v319_v49  ;;  %v331_v16 = vfloor.f32 %v323_v2 }
 0x2ed   :  { %v306_v39 = vadd.f32 %v298_v37, %v274_v62  ;;  %vm344_vm7 = vcmp.eq.f32.partialorder %v326_v34, %v341_v43  ;;  %v329_v1 = vfloor.f32 %v321_v56 }
 0x2ee   :  { %vm345_vm8 = vcmp.eq.f32.partialorder %v327_v55, %v341_v43  ;;  %vm349_vm12 = vcmp.eq.f32.partialorder %v331_v16, %v341_v43 }
 0x2ef   :  { %v314_v51 = vadd.f32 0.5, %v306_v39  ;;  %vm347_vm10 = vcmp.eq.f32.partialorder %v329_v1, %v341_v43 }
 0x2f1   :  { %v322_v62 = vmul.f32 0.125, %v314_v51 }
 0x2f3   :  { %v330_v9 = vfloor.f32 %v322_v62 }
 0x2f5   :  { %vm348_vm11 = vcmp.eq.f32.partialorder %v330_v9, %v341_v43 }
 0x3a8   :  { %v3385_v52 = vpop.f32.mrb[2].mxu0 }
 0x3a9   :  { %v505_v53 = vsel %vm343_vm4, %v3385_v52, -1e+30  ;;  %v465_v54 = vpop.f32.mrb[3].mxu0  ;;  %vm4156_vm4 = vmmov 0  }
 0x3aa   :  { %v504_v58 = vsel %vm342_vm5, %v465_v54, -1e+30  ;;  %v516_v59 = vsel %vm512_vm6, %v505_v53, -inf  ;;  %vm1982_vm5 = vcmask 1041408  }
 0x3ab   :  { %517 = vmax.xlane.f32.xlu1 %v516_v59  ;;  %v513_v60 = vsel %vm512_vm6, %v504_v58, -inf }
 0x3ac   :  { %514 = vmax.xlane.f32.xlu0 %v513_v60  ;;  %v3388_v63 = vpop.f32.mrb[4].mxu0 }
 0x3ad   :  { %v475_v0 = vpop.f32.mrb[5].mxu0  ;;  %v507_v12 = vsel %vm345_vm8, %v3388_v63, -1e+30  ;;  %vm1986_vm8 = vcmask 1045504  }
 0x3ae   :  { %v506_v6 = vsel %vm344_vm7, %v475_v0, -1e+30  ;;  %v522_v18 = vsel %vm512_vm6, %v507_v12, -inf  ;;  %vm1984_vm7 = vcmask 1043456  }
 0x3af   :  { %v519_v7 = vsel %vm512_vm6, %v506_v6, -inf }
 0x3b0   :  { %520 = vmax.xlane.f32.xlu0 %v519_v7  ;;  %v3391_v14 = vpop.f32.mrb[6].mxu0 }
 0x3b1   :  { %v485_v15 = vpop.f32.mrb[7].mxu0  ;;  %v509_v21 = vsel %vm347_vm10, %v3391_v14, -1e+30 }
 0x3b2   :  { %v508_v17 = vsel %vm346_vm9, %v485_v15, -1e+30  ;;  %v528_v28 = vsel %vm512_vm6, %v509_v21, -inf  ;;  %vm2092_vm9 = vcmask 392192  }
 0x3b3   :  { %v525_v20 = vsel %vm512_vm6, %v508_v17, -inf }
 0x3b4   :  { %523 = vmax.xlane.f32.xlu0 %v522_v18  ;;  %526 = vmax.xlane.f32.xlu1 %v525_v20  ;;  %v3394_v23 = vpop.f32.mrb[8].mxu0 }
 0x3b5   :  { %v495_v27 = vpop.f32.mrb[9].mxu0  ;;  %v511_v13 = vsel %vm349_vm12, %v3394_v23, -1e+30 }
 0x3b6   :  { %v510_v11 = vsel %vm348_vm11, %v495_v27, -1e+30  ;;  %v534_v33 = vsel %vm512_vm6, %v511_v13, -inf }
 0x3b7   :  { %v531_v32 = vsel %vm512_vm6, %v510_v11, -inf }
 0x3b8   :  { %529 = vmax.xlane.f32.xlu0 %v528_v28  ;;  %532 = vmax.xlane.f32.xlu1 %v531_v32 }
 0x3bc   :  { %535 = vmax.xlane.f32.xlu0 %v534_v33 }
 0x3c9   :  { %3908 = vrot.lane.b32.xlu1 %v4201_v36, %s4150_s29 }
 0x438   :  { %v518_v35 = vpop.xlane.xlu1 %517 }
 0x439   :  { %v538_v24 = vsub.f32 %v505_v53, %v518_v35  ;;  %v515_v25 = vpop.xlane.xlu0 %514 }
 0x43a   :  { %v537_v26 = vsub.f32 %v504_v58, %v515_v25 }
 0x43b   :  { %v547_v37 = vmul.f32 1.442695, %v538_v24 }
 0x43c   :  { %v545_v19 = vmul.f32 1.442695, %v537_v26 }
 0x43d   :  { %3927 = vpow2.f32 %v547_v37  ;;  %v521_v38 = vpop.xlane.xlu0 %520 }
 0x43e   :  { %3929 = vpow2.f32 %v545_v19  ;;  %v539_v40 = vsub.f32 %v506_v6, %v521_v38 }
 0x440   :  { %v549_v22 = vmul.f32 1.442695, %v539_v40 }
 0x441   :  { %v524_v43 = vpop.xlane.xlu0 %523  ;;  %v527_v46 = vpop.xlane.xlu1 %526 }
 0x442   :  { %3931 = vpow2.f32 %v549_v22  ;;  %v540_v47 = vsub.f32 %v507_v12, %v524_v43  ;;  %v541_v48 = vsub.f32 %v508_v17, %v527_v46 }
 0x444   :  { %v551_v39 = vmul.f32 1.442695, %v540_v47  ;;  %v553_v49 = vmul.f32 1.442695, %v541_v48 }
 0x445   :  { %v530_v31 = vpop.xlane.xlu0 %529  ;;  %v533_v36 = vpop.xlane.xlu1 %532 }
 0x446   :  { %3933 = vpow2.f32 %v551_v39  ;;  %v542_v44 = vsub.f32 %v509_v21, %v530_v31  ;;  %v543_v52 = vsub.f32 %v510_v11, %v533_v36 }
 0x447   :  { %v4274_v34 = vpop.eup %3927  ;;  %3935 = vpow2.f32 %v553_v49 }
 0x448   :  { %v3930_v50 = vpop.eup %3929  ;;  %v555_v51 = vmul.f32 1.442695, %v542_v44  ;;  %v564_v53 = vsel %vm512_vm6, %v4274_v34, 0.0  ;;  %v557_v61 = vmul.f32 1.442695, %v543_v52 }
 0x449   :  { %565 = vadd.xlane.f32.xlu0 %v564_v53  ;;  %v536_v54 = vpop.xlane.xlu0 %535  ;;  %v3909_v55 = vpop.permute.xlu1 %3908  ;;  %v561_v56 = vsel %vm512_vm6, %v3930_v50, 0.0 }
 0x44a   :  { %3937 = vpow2.f32 %v555_v51  ;;  %v544_v57 = vsub.f32 %v511_v13, %v536_v54  ;;  %v3911_v58 = vunpack.i.h.bf16 %v3909_v55  ;;  %v3910_v59 = vunpack.i.l.bf16 %v3909_v55  ;;  %562 = vadd.xlane.f32.xlu1 %v561_v56  ;;  %v786_v54 = vld [vmem:[#allocation2 + $0x82] sm:$0xff]  ;;  %v787_v55 = vld [vmem:[#allocation2 + $0x8a] sm:$0xff] }
 0x44b   :  { %v3730_v56 = vpack.c.bf16 %v787_v55, %v786_v54 }
 0x44c   :  { %v4279_v60 = vpop.eup %3931  ;;  %v559_v62 = vmul.f32 1.442695, %v544_v57  ;;  %v3714_v63 = vpack.c.bf16 %v3911_v58, %v3910_v59  ;;  %v788_v57 = vld [vmem:[#allocation2 + $0x92] sm:$0xff]  ;;  %v789_v58 = vld [vmem:[#allocation2 + $0x9a] sm:$0xff] }
 0x44d   :  { %v567_v0 = vsel %vm512_vm6, %v4279_v60, 0.0  ;;  %3731 = vmatprep.subr.bf16.mxu0 %v3730_v56 }
 0x44e   :  { %3939 = vpow2.f32 %v559_v62  ;;  %568 = vadd.xlane.f32.xlu1 %v567_v0  ;;  %3715 = vmatprep.subr.bf16.mxu1 %v3714_v63 }
 0x44f   :  { %3717 = vmatpush3.bf16.msra.mxu1 %v3714_v63  ;;  %3941 = vpow2.f32 %v557_v61  ;;  %3733 = vmatpush3.bf16.msra.mxu0 %v3730_v56 }
 0x450   :  { %v4283_v1 = vpop.eup %3933 }
 0x451   :  { %v4285_v2 = vpop.eup %3935  ;;  %v570_v6 = vsel %vm512_vm6, %v4283_v1, 0.0 }
 0x452   :  { %571 = vadd.xlane.f32.xlu0 %v570_v6  ;;  %v573_v7 = vsel %vm512_vm6, %v4285_v2, 0.0 }
 0x453   :  { %574 = vadd.xlane.f32.xlu1 %v573_v7 }
 0x454   :  { %v4291_v9 = vpop.eup %3937 }
 0x455   :  { %v576_v12 = vsel %vm512_vm6, %v4291_v9, 0.0 }
 0x456   :  { %577 = vadd.xlane.f32.xlu0 %v576_v12 }
 0x458   :  { %v4295_v14 = vpop.eup %3939 }
 0x459   :  { %v582_v15 = vsel %vm512_vm6, %v4295_v14, 0.0  ;;  %v3942_v16 = vpop.eup %3941 }
 0x45a   :  { %583 = vadd.xlane.f32.xlu0 %v582_v15  ;;  %v579_v17 = vsel %vm512_vm6, %v3942_v16, 0.0 }
 0x45e   :  { %580 = vadd.xlane.f32.xlu0 %v579_v17 }
 0x464   :  { %3918 = vrot.lane.b32.xlu1 %v4205_v41, %s4150_s29 }
 0x468   :  { %3923 = vrot.lane.b32.xlu1 %v4213_v45, %s4150_s29 }
 0x474   :  { %3913 = vrot.lane.b32.xlu0 %v4207_v42, %s4150_s29 }
 0x4d6   :  { %v566_v20 = vpop.xlane.xlu0 %565 }
 0x4d7   :  { %v563_v18 = vpop.xlane.xlu1 %562 }
 0x4d8   :  { %3943 = vrcp.f32 %v563_v18 }
 0x4d9   :  { %3945 = vrcp.f32 %v566_v20 }
 0x4db   :  { %v569_v21 = vpop.xlane.xlu1 %568 }
 0x4dc   :  { %3947 = vrcp.f32 %v569_v21 }
 0x4df   :  { %v572_v23 = vpop.xlane.xlu0 %571 }
 0x4e0   :  { %v575_v32 = vpop.xlane.xlu1 %574  ;;  %3949 = vrcp.f32 %v572_v23 }
 0x4e1   :  { %3951 = vrcp.f32 %v575_v32 }
 0x4e2   :  { %v3944_v27 = vpop.eup %3943 }
 0x4e3   :  { %v578_v11 = vpop.xlane.xlu0 %577  ;;  %v593_v28 = vmul.f32 %v3944_v27, %v3930_v50  ;;  %v3946_v43 = vpop.eup %3945 }
 0x4e4   :  { %v3919_v33 = vpop.permute.xlu1 %3918  ;;  %3953 = vrcp.f32 %v578_v11  ;;  %v594_v47 = vmul.f32 %v3946_v43, %v4274_v34  ;;  %v3114_v11 = vld [vmem:[#allocation2 + $0xa2] ss:$0 sm:$0xff] }
 0x4e5   :  { %3411 = vmatprep.mubr.msk.f32.mxu1 %vm512_vm6, %v593_v28  ;;  %v3921_v24 = vunpack.i.h.bf16 %v3919_v33  ;;  %v3920_v45 = vunpack.i.l.bf16 %v3919_v33 }
 0x4e6   :  { %v3948_v46 = vpop.eup %3947 }
 0x4e7   :  { %v584_v13 = vpop.xlane.xlu0 %583  ;;  %v3722_v19 = vpack.c.bf16 %v3921_v24, %v3920_v45  ;;  %v595_v39 = vmul.f32 %v3948_v46, %v4279_v60  ;;  %v3734_v60 = vpack.c.bf16 %v789_v58, %v788_v57  ;;  %v3117_v58 = vld [vmem:[#allocation2 + $0xa3] ss:$0 sm:$0xff] }
 0x4e8   :  { %v3924_v42 = vpop.permute.xlu1 %3923 }
 0x4e9   :  { %v3926_v38 = vunpack.i.h.bf16 %v3924_v42  ;;  %v3925_v40 = vunpack.i.l.bf16 %v3924_v42  ;;  %3735 = vmatprep.subr.bf16.mxu0 %v3734_v60 }
 0x4ea   :  { %v3950_v48 = vpop.eup %3949  ;;  %3737 = vmatpush3.bf16.msra.mxu0 %v3734_v60 }
 0x4eb   :  { %v581_v41 = vpop.xlane.xlu0 %580  ;;  %v3726_v22 = vpack.c.bf16 %v3926_v38, %v3925_v40  ;;  %v3952_v49 = vpop.eup %3951  ;;  %v596_v31 = vmul.f32 %v3950_v48, %v4283_v1 }
 0x4ec   :  { %3955 = vrcp.f32 %v581_v41  ;;  %v597_v44 = vmul.f32 %v3952_v49, %v4285_v2 }
 0x4ed   :  { %3957 = vrcp.f32 %v584_v13 }
 0x4ee   :  { %v3954_v36 = vpop.eup %3953 }
 0x4ef   :  { %v3914_v35 = vpop.permute.xlu0 %3913  ;;  %v598_v34 = vmul.f32 %v3954_v36, %v4291_v9 }
 0x4f0   :  { %v3916_v25 = vunpack.i.h.bf16 %v3914_v35  ;;  %v3915_v26 = vunpack.i.l.bf16 %v3914_v35 }
 0x4f2   :  { %v3718_v37 = vpack.c.bf16 %v3916_v25, %v3915_v26 }
 0x4f4   :  { %3719 = vmatprep.subr.bf16.mxu1 %v3718_v37 }
 0x4f5   :  { %3721 = vmatpush3.bf16.msra.mxu1 %v3718_v37 }
 0x4f6   :  { %3723 = vmatprep.subr.bf16.mxu1 %v3722_v19  ;;  %v3956_v50 = vpop.eup %3955 }
 0x4f7   :  { %v3958_v51 = vpop.eup %3957  ;;  %v599_v52 = vmul.f32 %v3956_v50, %v3942_v16 }
 0x4f8   :  { %v600_v53 = vmul.f32 %v3958_v51, %v4295_v14 }
 0x4f9   :  { %3725 = vmatpush3.bf16.msra.mxu1 %v3722_v19 }
 0x4fa   :  { %3727 = vmatprep.subr.bf16.mxu1 %v3726_v22 }
 0x4fd   :  { %3729 = vmatpush3.bf16.msra.mxu1 %v3726_v22 }
 0x500   :  { %3412 = vmatmul.mubr.msk.f32.vlgmr.msra.gmra.mrb[2].mxu1 %vm512_vm6, %v594_v47 }
 0x501   :  { %3414 = vmatprep.mubr.msk.f32.mxu1 %vm512_vm6, %v595_v39 }
 0x504   :  { %3415 = vmatmul.mubr.msk.f32.gmra.mrb[4].mxu1 %vm512_vm6, %v596_v31  ;;  %v4153_v31 = vmov 0.0  }
 0x505   :  { %3417 = vmatprep.mubr.msk.f32.mxu1 %vm512_vm6, %v597_v44 }
 0x508   :  { %3418 = vmatmul.mubr.msk.f32.gmra.mrb[6].mxu1 %vm512_vm6, %v598_v34  ;;  %v919_v34 = vmul.f32 0.5, %v4253_v8 }
 0x509   :  { %3420 = vmatprep.mubr.msk.f32.mxu1 %vm512_vm6, %v599_v52 }
 0x50c   :  { %3421 = vmatmul.mubr.msk.f32.gmra.mrb[8].mxu1 %vm512_vm6, %v600_v53  ;;  %v921_v53 = vfloor.f32 %v919_v34 }
 0x5d3   :  { %v3413_v59 = vpop.f32.mrb[2].mxu1 }
 0x5d4   :  { %v715_v61 = vpop.f32.mrb[3].mxu1 }
 0x5d7   :  { %v3416_v62 = vpop.f32.mrb[4].mxu1 }
 0x5d8   :  { %758 = vrot.lane.b32.xlu1 %v3416_v62, %s4145_s20  ;;  %v725_v63 = vpop.f32.mrb[5].mxu1 }
 0x5db   :  { %v3419_v0 = vpop.f32.mrb[6].mxu1 }
 0x5dc   :  { %756 = vrot.lane.b32.xlu1 %v725_v63, %s4145_s20  ;;  %v735_v1 = vpop.f32.mrb[7].mxu1  ;;  %v3118_v63 = vld [vmem:[#allocation2 + $0xa4] ss:$0 sm:$0xff] }
 0x5dd   :  { %764 = vrot.lane.b32.xlu0 %v735_v1, %s4151_s30 }
 0x5df   :  { %v3422_v2 = vpop.f32.mrb[8].mxu1 }
 0x5e0   :  { %766 = vrot.lane.b32.xlu1 %v3419_v0, %s4151_s30  ;;  %v745_v6 = vpop.f32.mrb[9].mxu1 }
 0x5e1   :  { %772 = vrot.lane.b32.xlu0 %v745_v6, %s4152_s3 }
 0x5e4   :  { %774 = vrot.lane.b32.xlu1 %v3422_v2, %s4152_s3 }
 0x64a   :  { %v759_v7 = vpop.permute.xlu1 %758 }
 0x64b   :  { %v779_v20 = vsel %vm366_vm2, %v3413_v59, %v759_v7 }
 0x64e   :  { %v757_v9 = vpop.permute.xlu1 %756 }
 0x64f   :  { %v765_v12 = vpop.permute.xlu0 %764  ;;  %v778_v14 = vsel %vm366_vm2, %v715_v61, %v757_v9 }
 0x650   :  { %v781_v16 = vsel %vm780_vm13, %v778_v14, %v765_v12 }
 0x652   :  { %v767_v15 = vpop.permute.xlu1 %766 }
 0x653   :  { %v773_v17 = vpop.permute.xlu0 %772  ;;  %v782_v21 = vsel %vm780_vm13, %v779_v20, %v767_v15  ;;  %v935_v15 = vsub.f32 7.0, %v921_v53 }
 0x654   :  { %v784_v18 = vsel %vm783_vm14, %v781_v16, %v773_v17 }
 0x655   :  { %3431 = vmatprep.mubr.msk.f32.mxu0 %vm37_vm0, %v784_v18  ;;  %v937_v16 = vmul.f32 2.0, %v935_v15 }
 0x656   :  { %v775_v23 = vpop.permute.xlu1 %774 }
 0x657   :  { %v785_v27 = vsel %vm783_vm14, %v782_v21, %v775_v23 }
 0x658   :  { %3432 = vmatmul.mubr.msk.f32.vlgmr.msra.gmra.mrb[10].mxu0 %vm37_vm0, %v785_v27  ;;  %v1116_v27 = vld [vmem:[#allocation2 + $0xa5] sm:$0xff] }
 0x72b   :  { %v3433_v28 = vpop.f32.mrb[10].mxu0 }
 0x72c   :  { %v873_v32 = vadd.f32 %v3433_v28, %v3114_v11  ;;  %v867_v13 = vpop.f32.mrb[11].mxu0  ;;  %v1118_v28 = vld [vmem:[#allocation2 + $0xb5] sm:$0xff] }
 0x72d   :  { %v868_v33 = vadd.f32 %v3114_v11, %v867_v13  ;;  %v1117_v11 = vld [vmem:[#allocation2 + $0xad] sm:$0xff]  ;;  %v1119_v13 = vld [vmem:[#allocation2 + $0xbd] sm:$0xff] }
 0x72e   :  { %v877_v41 = vadd.f32 %v873_v32, %v4196_v30  ;;  %v3746_v32 = vpack.c.bf16 %v1117_v11, %v1116_v27 }
 0x72f   :  { %v876_v35 = vadd.f32 %v868_v33, %v4194_v29  ;;  %v918_v29 = vmul.f32 0.5, %v4257_v10  ;;  %v3750_v33 = vpack.c.bf16 %v1119_v13, %v1118_v28 }
 0x730   :  { %v881_v24 = vsel %vm37_vm0, %v877_v41, 0.0 }
 0x731   :  { %882 = vadd.xlane.f32.xlu1 %v881_v24  ;;  %v878_v45 = vsel %vm37_vm0, %v876_v35, 0.0  ;;  %v920_v46 = vfloor.f32 %v918_v29  ;;  %v1122_v24 = vld [vmem:[#allocation2 + $0xd5] sm:$0xff] }
 0x732   :  { %879 = vadd.xlane.f32.xlu0 %v878_v45  ;;  %v1123_v45 = vld [vmem:[#allocation2 + $0xdd] sm:$0xff] }
 0x733   :  { %v922_v47 = vmul.f32 2.0, %v920_v46 }
 0x735   :  { %v924_v48 = vsub.f32 %v4250_v5, %v922_v47  ;;  %v923_v5 = vmul.f32 2.0, %v921_v53 }
 0x737   :  { %v926_v39 = vmul.f32 8.0, %v924_v48  ;;  %v925_v55 = vsub.f32 %v4246_v3, %v923_v5  ;;  %v934_v3 = vsub.f32 7.0, %v920_v46  ;;  %v4155_v5 = vmov 0.0|0.0  }
 0x739   :  { %v928_v49 = vadd.f32 %v926_v39, %v920_v46  ;;  %v927_v59 = vmul.f32 8.0, %v925_v55  ;;  %v936_v9 = vmul.f32 2.0, %v934_v3  ;;  %v939_v17 = vadd.f32 %v937_v16, %v925_v55 }
 0x73b   :  { %vm930_vm15 = vcmp.eq.f32.partialorder %v4248_v4, %v928_v49  ;;  %v929_v8 = vadd.f32 %v927_v59, %v921_v53  ;;  %v938_v12 = vadd.f32 %v936_v9, %v924_v48  ;;  %vm941_vm3 = vcmp.eq.f32.partialorder %v4248_v4, %v939_v17  ;;  %v1211_v53 = vld [vmem:[#allocation2 + $0xee] sm:$0xff] }
 0x73c   :  { %v932_v36 = vsel %vm930_vm15, 1.0, %v4153_v31  ;;  %v4352_v23 = vsel %vm941_vm3, 1.0, %v4153_v31 }
 0x73d   :  { %3438 = vmatprep.mubr.msk.f32.mxu1 %vm780_vm13, %v932_v36  ;;  %vm931_vm1 = vcmp.eq.f32.partialorder %v4248_v4, %v929_v8  ;;  %vm940_vm2 = vcmp.eq.f32.partialorder %v4248_v4, %v938_v12 }
 0x73e   :  { %v933_v7 = vsel %vm931_vm1, 1.0, %v4153_v31  ;;  %v4346_v14 = vsel %vm940_vm2, 1.0, %v4153_v31 }
 0x73f   :  { %3445 = vmatprep.mubr.msk.f32.mxu0 %vm780_vm13, %v4346_v14 }
 0x7be   :  { %v883_v25 = vpop.xlane.xlu1 %882 }
 0x7bf   :  { %v885_v26 = vmul.f32 0.03125, %v883_v25  ;;  %v880_v42 = vpop.xlane.xlu0 %879  ;;  %v3758_v25 = vpack.c.bf16 %v1123_v45, %v1122_v24 }
 0x7c0   :  { %v884_v37 = vmul.f32 0.03125, %v880_v42 }
 0x7c1   :  { %v887_v19 = vsub.f32 %v877_v41, %v885_v26  ;;  %v1120_v41 = vld [vmem:[#allocation2 + $0xc5] sm:$0xff] }
 0x7c2   :  { %v886_v38 = vsub.f32 %v876_v35, %v884_v37  ;;  %v1121_v35 = vld [vmem:[#allocation2 + $0xcd] sm:$0xff] }
 0x7c3   :  { %v889_v43 = vmul.f32 %v887_v19, %v887_v19  ;;  %v3754_v4 = vpack.c.bf16 %v1121_v35, %v1120_v41 }
 0x7c4   :  { %v888_v40 = vmul.f32 %v886_v38, %v886_v38 }
 0x7c5   :  { %v893_v30 = vsel %vm37_vm0, %v889_v43, 0.0 }
 0x7c6   :  { %v890_v22 = vsel %vm37_vm0, %v888_v40, 0.0 }
 0x7c7   :  { %891 = vadd.xlane.f32.xlu0 %v890_v22  ;;  %v3123_v22 = vld [vmem:[#allocation2 + $0xe5] ss:$0 sm:$0xff] }
 0x7cb   :  { %894 = vadd.xlane.f32.xlu0 %v893_v30 }
 0x854   :  { %v892_v44 = vpop.xlane.xlu0 %891 }
 0x855   :  { %v896_v50 = vmul.f32 0.03125, %v892_v44 }
 0x857   :  { %v898_v51 = vadd.f32 1e-05, %v896_v50 }
 0x858   :  { %v895_v52 = vpop.xlane.xlu0 %894 }
 0x859   :  { %3959 = vrsqrt.f32 %v898_v51  ;;  %v897_v10 = vmul.f32 0.03125, %v895_v52 }
 0x85b   :  { %v899_v54 = vadd.f32 1e-05, %v897_v10  ;;  %v1210_v10 = vld [vmem:[#allocation2 + $0xe6] sm:$0xff] }
 0x85c   :  { %v4371_v55 = vpack.c.bf16 %v1211_v53, %v1210_v10 }
 0x85d   :  { %3961 = vrsqrt.f32 %v899_v54  ;;  %v1212_v54 = vld [vmem:[#allocation2 + $0xf6] sm:$0xff] }
 0x863   :  { %v3960_v56 = vpop.eup %3959 }
 0x864   :  { %v902_v57 = vmul.f32 %v3960_v56, %v886_v38  ;;  %v1213_v56 = vld [vmem:[#allocation2 + $0xfe] sm:$0xff] }
 0x866   :  { %v909_v62 = vmul.f32 %v3117_v58, %v902_v57  ;;  %v4379_v57 = vpack.c.bf16 %v1213_v56, %v1212_v54 }
 0x867   :  { %v3962_v60 = vpop.eup %3961 }
 0x868   :  { %v903_v61 = vmul.f32 %v3962_v60, %v887_v19  ;;  %v916_v1 = vadd.f32 %v3118_v63, %v909_v62 }
 0x86a   :  { %v910_v0 = vmul.f32 %v3117_v58, %v903_v61 }
 0x86c   :  { %v917_v2 = vadd.f32 %v3118_v63, %v910_v0 }
 0x86e   :  { %v3738_v6 = vpack.c.bf16 %v917_v2, %v916_v1 }
 0x870   :  { %3739 = vmatprep.subr.bf16.mxu1 %v3738_v6 }
 0x871   :  { %3741 = vmatpush3.bf16.msra.mxu1 %v3738_v6 }
 0x872   :  { %3747 = vmatprep.subr.bf16.mxu1 %v3746_v32 }
 0x874   :  { %3439 = vmatmul.mubr.msk.f32.vlgmr.msra.gmra.mrb[10].mxu1 %vm780_vm13, %v933_v7 }
 0x875   :  { %3749 = vmatpush3.bf16.msra.mxu1 %v3746_v32 }
 0x876   :  { %3751 = vmatprep.subr.bf16.mxu1 %v3750_v33 }
 0x879   :  { %3753 = vmatpush3.bf16.msra.mxu1 %v3750_v33 }
 0x87a   :  { %3755 = vmatprep.subr.bf16.mxu1 %v3754_v4 }
 0x87d   :  { %3757 = vmatpush3.bf16.msra.mxu1 %v3754_v4 }
 0x87e   :  { %3759 = vmatprep.subr.bf16.mxu1 %v3758_v25 }
 0x881   :  { %3761 = vmatpush3.bf16.msra.mxu1 %v3758_v25 }
 0x882   :  { %3774 = vmatprep.subr.bf16.mxu1 %v4155_v5 }
 0x947   :  { %v3440_v18 = vpop.f32.mrb[10].mxu1 }
 0x948   :  { %v1016_v20 = vpop.f32.mrb[11].mxu1 }
 0x949   :  { %v3742_v21 = vpack.c.bf16 %v3440_v18, %v1016_v20 }
 0x94b   :  { %3743 = vmatprep.subr.bf16.mxu0 %v3742_v21 }
 0x94c   :  { %3745 = vmatpush3.bf16.msra.mxu0 %v3742_v21 }
 0x94d   :  { %3762 = vmatprep.subr.bf16.mxu0 %v4155_v5 }
 0x94f   :  { %3446 = vmatmul.mubr.msk.f32.vlgmr.msra.gmra.mrb[12].mxu0 %vm780_vm13, %v4352_v23 }
 0x950   :  { %3475 = vmatprep.mubr.msk.f32.mxu0 %vm4156_vm4, %v4153_v31  ;;  %3764 = vmatpush3.bf16.msra.mxu0 %v4371_v55 }
 0x951   :  { %3765 = vmatprep.subr.bf16.mxu0 %v4155_v5 }
 0x954   :  { %3767 = vmatpush3.bf16.msra.mxu0 %v4379_v57 }
 0x955   :  { %3768 = vmatprep.subr.bf16.mxu0 %v4155_v5 }
 0xa22   :  { %v3447_v26 = vpop.f32.mrb[12].mxu0 }
 0xa23   :  { %1110 = vrot.lane.b32.xlu0 %v3447_v26, %s4154_s4  ;;  %v1097_v42 = vpop.f32.mrb[13].mxu0 }
 0xa24   :  { %1108 = vrot.lane.b32.xlu1 %v1097_v42, %s4154_s4 }
 0xa95   :  { %v1111_v37 = vpop.permute.xlu0 %1110 }
 0xa96   :  { %v1109_v19 = vpop.permute.xlu1 %1108  ;;  %v1115_v40 = vsel %vm37_vm0, %v3440_v18, %v1111_v37 }
 0xa97   :  { %v1114_v38 = vsel %vm37_vm0, %v1016_v20, %v1109_v19 }
 0xa98   :  { %3464 = vmatprep.mubr.msk.f32.mxu1 %vm512_vm6, %v1114_v38 }
 0xa99   :  { %3465 = vmatmul.mubr.msk.f32.vlgmr.msra.gmra.mrb[12].mxu1 %vm512_vm6, %v1115_v40 }
 0xa9a   :  { %3497 = vmatprep.mubr.msk.f32.mxu1 %vm4156_vm4, %v4153_v31  ;;  %3776 = vmatpush3.bf16.msra.mxu1 %v4371_v55 }
 0xa9b   :  { %3777 = vmatprep.subr.bf16.mxu1 %v4155_v5 }
 0xa9e   :  { %3779 = vmatpush3.bf16.msra.mxu1 %v4379_v57 }
 0xa9f   :  { %3786 = vmatprep.subr.bf16.mxu1 %v4155_v5 }
 0xb6c   :  { %v3466_v43 = vpop.f32.mrb[12].mxu1 }
 0xb6d   :  { %v4362_v30 = vadd.f32 %v3466_v43, %v3123_v22  ;;  %v1201_v29 = vpop.f32.mrb[13].mxu1 }
 0xb6e   :  { %v4364_v46 = vadd.f32 %v3123_v22, %v1201_v29 }
 0xb70   :  { %3963 = vtanh.f32 %v4364_v46  ;;  %v3126_v48 = vmul.f32 -1.442695, %v4364_v46 }
 0xb72   :  { %3965 = vpow2.f32 %v3126_v48 }
 0xb7a   :  { %v3964_v47 = vpop.eup %3963 }
 0xb7b   :  { %1223 = vrot.lane.b32.xlu1 %v3964_v47, %s4154_s4 }
 0xb7c   :  { %v3966_v39 = vpop.eup %3965 }
 0xb7d   :  { %v1217_v49 = vadd.f32 1.0, %v3966_v39 }
 0xb7f   :  { %3967 = vrcp.f32 %v1217_v49 }
 0xb89   :  { %v3968_v36 = vpop.eup %3967 }
 0xb8a   :  { %v1221_v34 = vmul.f32 0.0, %v3968_v36 }
 0xbed   :  { %v1224_v44 = vpop.permute.xlu1 %1223 }
 0xbee   :  { %v1226_v50 = vmul.f32 %v3968_v36, %v1224_v44 }
 0xbf0   :  { %1228 = vrot.lane.b32.xlu1 %v1226_v50, %s4154_s4 }
 0xc62   :  { %v1229_v51 = vpop.permute.xlu1 %1228 }
 0xc63   :  { %v1231_v52 = vadd.f32 %v1229_v51, %v1221_v34 }
 0xc65   :  { %3969 = vtanh.f32 %v1231_v52  ;;  %v1325_v15 = vrot.slane %v1231_v52, 6 }
 0xc6f   :  { %v3970_v58 = vpop.eup %3969 }
 0xc70   :  { %1234 = vrot.lane.b32.xlu0 %v3970_v58, %s4154_s4 }
 0xce2   :  { %v1235_v59 = vpop.permute.xlu0 %1234 }
 0xce3   :  { %v4389_v60 = vmul.f32 %v3968_v36, %v1235_v59 }
 0xce5   :  { %1239 = vrot.lane.b32.xlu1 %v4389_v60, %s4150_s29 }
 0xd57   :  { %v1240_v61 = vpop.permute.xlu1 %1239 }
 0xd58   :  { %3476 = vmatmul.mubr.msk.f32.vlgmr.msra.gmra.mrb[14].mxu0 %vm37_vm0, %v1240_v61 }
 0xd59   :  { %3770 = vmatpush3.bf16.msra.mxu0 %v4371_v55  ;;  %3486 = vmatprep.mubr.msk.f32.mxu0 %vm4156_vm4, %v4153_v31 }
 0xd5a   :  { %3771 = vmatprep.subr.bf16.mxu0 %v4155_v5 }
 0xd5d   :  { %3773 = vmatpush3.bf16.msra.mxu0 %v4379_v57 }
 0xd5e   :  { %3780 = vmatprep.subr.bf16.mxu0 %v4155_v5 }
 0xe2b   :  { %v1309_v62 = vpop.f32.mrb[14].mxu0 }
 0xe2c   :  { %v1314_v63 = vrot.slane %v1309_v62, 6  ;;  %v3477_v0 = vpop.f32.mrb[15].mxu0 }
 0xe2e   :  { %v1316_v8 = vadd.f32 %v1314_v63, %v4364_v46 }
 0xe30   :  { %3971 = vtanh.f32 %v1316_v8  ;;  %v3128_v2 = vmul.f32 -1.442695, %v1316_v8 }
 0xe32   :  { %3973 = vpow2.f32 %v3128_v2 }
 0xe3a   :  { %v3972_v1 = vpop.eup %3971 }
 0xe3b   :  { %1329 = vrot.lane.b32.xlu0 %v3972_v1, %s4154_s4 }
 0xe3c   :  { %v3974_v6 = vpop.eup %3973 }
 0xe3d   :  { %v1320_v7 = vadd.f32 1.0, %v3974_v6 }
 0xe3f   :  { %3975 = vrcp.f32 %v1320_v7 }
 0xe49   :  { %v3976_v3 = vpop.eup %3975 }
 0xe4a   :  { %v1327_v16 = vmul.f32 %v3976_v3, %v1325_v15 }
 0xead   :  { %v1330_v9 = vpop.permute.xlu0 %1329 }
 0xeae   :  { %v1332_v12 = vmul.f32 %v3976_v3, %v1330_v9 }
 0xeb0   :  { %1334 = vrot.lane.b32.xlu1 %v1332_v12, %s4154_s4 }
 0xf22   :  { %v1335_v17 = vpop.permute.xlu1 %1334 }
 0xf23   :  { %v1337_v18 = vadd.f32 %v1335_v17, %v1327_v16 }
 0xf25   :  { %3977 = vtanh.f32 %v1337_v18  ;;  %v1432_v37 = vrot.slane %v1337_v18, 6 }
 0xf2f   :  { %v3978_v20 = vpop.eup %3977 }
 0xf30   :  { %1340 = vrot.lane.b32.xlu0 %v3978_v20, %s4154_s4 }
 0xfa2   :  { %v1341_v21 = vpop.permute.xlu0 %1340 }
 0xfa3   :  { %v1343_v27 = vmul.f32 %v3976_v3, %v1341_v21 }
 0xfa5   :  { %v1345_v11 = vrot.slane %v1343_v27, 2  ;;  %v1983_v47 = vsel %vm1982_vm5, %v4389_v60, %v1343_v27 }
 0xfa7   :  { %1346 = vrot.lane.b32.xlu1 %v1345_v11, %s4150_s29 }
0x1019   :  { %v1347_v28 = vpop.permute.xlu1 %1346 }
0x101a   :  { %3487 = vmatmul.mubr.msk.f32.vlgmr.msra.gmra.mrb[16].mxu0 %vm37_vm0, %v1347_v28 }
0x101b   :  { %3782 = vmatpush3.bf16.msra.mxu0 %v4371_v55  ;;  %3508 = vmatprep.mubr.msk.f32.mxu0 %vm4156_vm4, %v4153_v31 }
0x101c   :  { %3783 = vmatprep.subr.bf16.mxu0 %v4155_v5 }
0x101f   :  { %3785 = vmatpush3.bf16.msra.mxu0 %v4379_v57 }
0x1020   :  { %3792 = vmatprep.subr.bf16.mxu0 %v4155_v5 }
0x10ed   :  { %v1416_v32 = vpop.f32.mrb[16].mxu0 }
0x10ee   :  { %v1421_v13 = vrot.slane %v1416_v32, 4  ;;  %v3488_v33 = vpop.f32.mrb[17].mxu0 }
0x10f0   :  { %v1423_v41 = vadd.f32 %v1421_v13, %v4364_v46 }
0x10f2   :  { %3979 = vtanh.f32 %v1423_v41  ;;  %v3130_v4 = vmul.f32 -1.442695, %v1423_v41 }
0x10f4   :  { %3981 = vpow2.f32 %v3130_v4 }
0x10fc   :  { %v3980_v35 = vpop.eup %3979 }
0x10fd   :  { %1436 = vrot.lane.b32.xlu0 %v3980_v35, %s4154_s4 }
0x10fe   :  { %v3982_v24 = vpop.eup %3981 }
0x10ff   :  { %v1427_v45 = vadd.f32 1.0, %v3982_v24 }
0x1101   :  { %3983 = vrcp.f32 %v1427_v45 }
0x110b   :  { %v3984_v25 = vpop.eup %3983 }
0x110c   :  { %v1434_v19 = vmul.f32 %v3984_v25, %v1432_v37 }
0x116f   :  { %v1437_v26 = vpop.permute.xlu0 %1436 }
0x1170   :  { %v1439_v42 = vmul.f32 %v3984_v25, %v1437_v26 }
0x1172   :  { %1441 = vrot.lane.b32.xlu1 %v1439_v42, %s4154_s4 }
0x11e4   :  { %v1442_v38 = vpop.permute.xlu1 %1441 }
0x11e5   :  { %v1444_v40 = vadd.f32 %v1442_v38, %v1434_v19 }
0x11e7   :  { %3985 = vtanh.f32 %v1444_v40  ;;  %v1539_v59 = vrot.slane %v1444_v40, 6 }
0x11f1   :  { %v3986_v22 = vpop.eup %3985 }
0x11f2   :  { %1447 = vrot.lane.b32.xlu0 %v3986_v22, %s4154_s4 }
0x1264   :  { %v1448_v43 = vpop.permute.xlu0 %1447 }
0x1265   :  { %v1450_v29 = vmul.f32 %v3984_v25, %v1448_v43 }
0x1267   :  { %v1452_v48 = vrot.slane %v1450_v29, 4  ;;  %v1985_v39 = vsel %vm1984_vm7, %v1983_v47, %v1450_v29 }
0x1269   :  { %1453 = vrot.lane.b32.xlu1 %v1452_v48, %s4150_s29 }
0x12db   :  { %v1454_v49 = vpop.permute.xlu1 %1453 }
0x12dc   :  { %3498 = vmatmul.mubr.msk.f32.vlgmr.msra.gmra.mrb[14].mxu1 %vm37_vm0, %v1454_v49 }
0x12dd   :  { %3788 = vmatpush3.bf16.msra.mxu1 %v4371_v55  ;;  %3519 = vmatprep.mubr.msk.f32.mxu1 %vm4156_vm4, %v4153_v31 }
0x12de   :  { %3789 = vmatprep.subr.bf16.mxu1 %v4155_v5 }
0x12e1   :  { %3791 = vmatpush3.bf16.msra.mxu1 %v4379_v57 }
0x12e2   :  { %3798 = vmatprep.subr.bf16.mxu1 %v4155_v5 }
0x13af   :  { %v1523_v36 = vpop.f32.mrb[14].mxu1 }
0x13b0   :  { %v1528_v44 = vrot.slane %v1523_v36, 2  ;;  %v3499_v50 = vpop.f32.mrb[15].mxu1 }
0x13b2   :  { %v1530_v34 = vadd.f32 %v1528_v44, %v4364_v46 }
0x13b4   :  { %3987 = vtanh.f32 %v1530_v34  ;;  %v3132_v52 = vmul.f32 -1.442695, %v1530_v34 }
0x13b6   :  { %3989 = vpow2.f32 %v3132_v52 }
0x13be   :  { %v3988_v51 = vpop.eup %3987 }
0x13bf   :  { %1543 = vrot.lane.b32.xlu0 %v3988_v51, %s4154_s4 }
0x13c0   :  { %v3990_v10 = vpop.eup %3989 }
0x13c1   :  { %v1534_v53 = vadd.f32 1.0, %v3990_v10 }
0x13c3   :  { %3991 = vrcp.f32 %v1534_v53 }
0x13cd   :  { %v3992_v54 = vpop.eup %3991 }
0x13ce   :  { %v1541_v60 = vmul.f32 %v3992_v54, %v1539_v59 }
0x1431   :  { %v1544_v56 = vpop.permute.xlu0 %1543 }
0x1432   :  { %v1546_v58 = vmul.f32 %v3992_v54, %v1544_v56 }
0x1434   :  { %1548 = vrot.lane.b32.xlu1 %v1546_v58, %s4154_s4 }
0x14a6   :  { %v1549_v61 = vpop.permute.xlu1 %1548 }
0x14a7   :  { %v1551_v62 = vadd.f32 %v1549_v61, %v1541_v60 }
0x14a9   :  { %3993 = vtanh.f32 %v1551_v62  ;;  %v1643_v21 = vrot.slane %v1551_v62, 6 }
0x14b3   :  { %v3994_v46 = vpop.eup %3993 }
0x14b4   :  { %1554 = vrot.lane.b32.xlu0 %v3994_v46, %s4154_s4 }
0x1526   :  { %v1555_v63 = vpop.permute.xlu0 %1554 }
0x1527   :  { %v1557_v0 = vmul.f32 %v3992_v54, %v1555_v63 }
0x1529   :  { %v1559_v8 = vrot.slane %v1557_v0, 6  ;;  %v4432_v1 = vsel %vm1986_vm8, %v1985_v39, %v1557_v0 }
0x152b   :  { %1560 = vrot.lane.b32.xlu1 %v1559_v8, %s4150_s29 }
0x159d   :  { %v1561_v2 = vpop.permute.xlu1 %1560 }
0x159e   :  { %3509 = vmatmul.mubr.msk.f32.vlgmr.msra.gmra.mrb[18].mxu0 %vm37_vm0, %v1561_v2 }
0x159f   :  { %3794 = vmatpush3.bf16.msra.mxu0 %v4371_v55  ;;  %3530 = vmatprep.mubr.msk.f32.mxu0 %vm4156_vm4, %v4153_v31 }
0x15a0   :  { %3795 = vmatprep.subr.bf16.mxu0 %v4155_v5 }
0x15a3   :  { %3797 = vmatpush3.bf16.msra.mxu0 %v4379_v57 }
0x1671   :  { %v1630_v6 = vpop.f32.mrb[18].mxu0 }
0x1672   :  { %v1634_v7 = vadd.f32 %v1630_v6, %v4362_v30  ;;  %v3510_v3 = vpop.f32.mrb[19].mxu0 }
0x1674   :  { %3995 = vtanh.f32 %v1634_v7  ;;  %v3134_v12 = vmul.f32 -1.442695, %v1634_v7 }
0x1676   :  { %3997 = vpow2.f32 %v3134_v12 }
0x167e   :  { %v3996_v9 = vpop.eup %3995 }
0x167f   :  { %1647 = vrot.lane.b32.xlu0 %v3996_v9, %s4154_s4 }
0x1680   :  { %v3998_v15 = vpop.eup %3997 }
0x1681   :  { %v1638_v16 = vadd.f32 1.0, %v3998_v15 }
0x1683   :  { %3999 = vrcp.f32 %v1638_v16 }
0x168d   :  { %v4000_v17 = vpop.eup %3999 }
0x168e   :  { %v1645_v27 = vmul.f32 %v4000_v17, %v1643_v21 }
0x16f1   :  { %v1648_v18 = vpop.permute.xlu0 %1647 }
0x16f2   :  { %v1650_v20 = vmul.f32 %v4000_v17, %v1648_v18 }
0x16f4   :  { %1652 = vrot.lane.b32.xlu1 %v1650_v20, %s4154_s4 }
0x1766   :  { %v1653_v11 = vpop.permute.xlu1 %1652 }
0x1767   :  { %v1655_v28 = vadd.f32 %v1653_v11, %v1645_v27 }
0x1769   :  { %4001 = vtanh.f32 %v1655_v28 }
0x1773   :  { %v4002_v32 = vpop.eup %4001 }
0x1774   :  { %1658 = vrot.lane.b32.xlu0 %v4002_v32, %s4154_s4 }
0x17e6   :  { %v1659_v13 = vpop.permute.xlu0 %1658 }
0x17e7   :  { %v4445_v33 = vmul.f32 %v4000_v17, %v1659_v13 }
0x17e9   :  { %1663 = vrot.lane.b32.xlu1 %v4445_v33, %s4150_s29 }
0x185b   :  { %v1664_v41 = vpop.permute.xlu1 %1663 }
0x185c   :  { %3520 = vmatmul.mubr.msk.f32.vlgmr.msra.gmra.mrb[16].mxu1 %vm37_vm0, %v1664_v41 }
0x185d   :  { %3800 = vmatpush3.bf16.msra.mxu1 %v4371_v55  ;;  %3541 = vmatprep.mubr.msk.f32.mxu1 %vm4156_vm4, %v4153_v31 }
0x185e   :  { %3801 = vmatprep.subr.bf16.mxu1 %v4155_v5 }
0x1861   :  { %3803 = vmatpush3.bf16.msra.mxu1 %v4379_v57  ;;  %v1749_v57 = vrot.slane %v1655_v28, 6 }
0x1862   :  { %3824 = vmatprep.subr.bf16.mxu1 %v4155_v5 }
0x192f   :  { %v1733_v35 = vpop.f32.mrb[16].mxu1 }
0x1930   :  { %v1738_v4 = vrot.slane %v1733_v35, 6  ;;  %v3521_v24 = vpop.f32.mrb[17].mxu1 }
0x1932   :  { %v1740_v45 = vadd.f32 %v1738_v4, %v4362_v30 }
0x1934   :  { %4003 = vtanh.f32 %v1740_v45  ;;  %v3136_v26 = vmul.f32 -1.442695, %v1740_v45 }
0x1936   :  { %4005 = vpow2.f32 %v3136_v26  ;;  %v2096_v26 = vld [vmem:[#allocation2 + $0x10e] sm:$0xff] }
0x193e   :  { %v4004_v25 = vpop.eup %4003 }
0x193f   :  { %1753 = vrot.lane.b32.xlu0 %v4004_v25, %s4154_s4  ;;  %v2095_v25 = vld [vmem:[#allocation2 + $0x106] sm:$0xff] }
0x1940   :  { %v4006_v55 = vpop.eup %4005 }
0x1941   :  { %v1744_v42 = vadd.f32 1.0, %v4006_v55  ;;  %v2097_v55 = vld [vmem:[#allocation2 + $0x116] sm:$0xff] }
0x1943   :  { %4007 = vrcp.f32 %v1744_v42  ;;  %v3808_v42 = vpack.c.bf16 %v2096_v26, %v2095_v25 }
0x194d   :  { %v4008_v37 = vpop.eup %4007 }
0x194e   :  { %v1751_v40 = vmul.f32 %v4008_v37, %v1749_v57  ;;  %v2100_v57 = vld [vmem:[#allocation2 + $0x12e] sm:$0xff] }
0x19b1   :  { %v1754_v19 = vpop.permute.xlu0 %1753 }
0x19b2   :  { %v1756_v38 = vmul.f32 %v4008_v37, %v1754_v19 }
0x19b4   :  { %1758 = vrot.lane.b32.xlu1 %v1756_v38, %s4154_s4  ;;  %v2099_v38 = vld [vmem:[#allocation2 + $0x126] sm:$0xff] }
0x1a26   :  { %v1759_v22 = vpop.permute.xlu1 %1758 }
0x1a27   :  { %v1761_v43 = vadd.f32 %v1759_v22, %v1751_v40  ;;  %v3816_v40 = vpack.c.bf16 %v2100_v57, %v2099_v38  ;;  %v2101_v22 = vld [vmem:[#allocation2 + $0x136] sm:$0xff] }
0x1a29   :  { %4009 = vtanh.f32 %v1761_v43 }
0x1a33   :  { %v4010_v29 = vpop.eup %4009 }
0x1a34   :  { %1764 = vrot.lane.b32.xlu0 %v4010_v29, %s4154_s4 }
0x1aa6   :  { %v1765_v47 = vpop.permute.xlu0 %1764 }
0x1aa7   :  { %v1767_v48 = vmul.f32 %v4008_v37, %v1765_v47  ;;  %v2098_v37 = vld [vmem:[#allocation2 + $0x11e] sm:$0xff] }
0x1aa8   :  { %v3812_v19 = vpack.c.bf16 %v2098_v37, %v2097_v55 }
0x1aa9   :  { %v1769_v39 = vrot.slane %v1767_v48, 2  ;;  %v1988_v0 = vsel %vm1982_vm5, %v4445_v33, %v1767_v48 }
0x1aab   :  { %1770 = vrot.lane.b32.xlu1 %v1769_v39, %s4150_s29 }
0x1b1d   :  { %v1771_v49 = vpop.permute.xlu1 %1770 }
0x1b1e   :  { %3531 = vmatmul.mubr.msk.f32.vlgmr.msra.gmra.mrb[20].mxu0 %vm37_vm0, %v1771_v49 }
0x1b1f   :  { %3548 = vmatprep.mubr.msk.f32.mxu0 %vm780_vm13, %v4346_v14  ;;  %v1856_v14 = vrot.slane %v1761_v43, 6  ;;  %v2102_v43 = vld [vmem:[#allocation2 + $0x13e] sm:$0xff] }
0x1b20   :  { %v3820_v29 = vpack.c.bf16 %v2102_v43, %v2101_v22 }
0x1bf1   :  { %v1840_v36 = vpop.f32.mrb[20].mxu0 }
0x1bf2   :  { %v1845_v44 = vrot.slane %v1840_v36, 4  ;;  %v3532_v50 = vpop.f32.mrb[21].mxu0 }
0x1bf4   :  { %v1847_v34 = vadd.f32 %v1845_v44, %v4362_v30 }
0x1bf6   :  { %4011 = vtanh.f32 %v1847_v34  ;;  %v3138_v52 = vmul.f32 -1.442695, %v1847_v34 }
0x1bf8   :  { %4013 = vpow2.f32 %v3138_v52 }
0x1c00   :  { %v4012_v51 = vpop.eup %4011 }
0x1c01   :  { %1860 = vrot.lane.b32.xlu0 %v4012_v51, %s4154_s4 }
0x1c02   :  { %v4014_v10 = vpop.eup %4013 }
0x1c03   :  { %v1851_v53 = vadd.f32 1.0, %v4014_v10 }
0x1c05   :  { %4015 = vrcp.f32 %v1851_v53 }
0x1c0f   :  { %v4016_v54 = vpop.eup %4015 }
0x1c10   :  { %v1858_v59 = vmul.f32 %v4016_v54, %v1856_v14 }
0x1c73   :  { %v1861_v56 = vpop.permute.xlu0 %1860 }
0x1c74   :  { %v1863_v58 = vmul.f32 %v4016_v54, %v1861_v56 }
0x1c76   :  { %1865 = vrot.lane.b32.xlu1 %v1863_v58, %s4154_s4 }
0x1ce8   :  { %v1866_v60 = vpop.permute.xlu1 %1865 }
0x1ce9   :  { %v1868_v61 = vadd.f32 %v1866_v60, %v1858_v59 }
0x1ceb   :  { %4017 = vtanh.f32 %v1868_v61  ;;  %v1963_v11 = vrot.slane %v1868_v61, 6 }
0x1cf5   :  { %v4018_v62 = vpop.eup %4017 }
0x1cf6   :  { %1871 = vrot.lane.b32.xlu0 %v4018_v62, %s4154_s4 }
0x1d68   :  { %v1872_v46 = vpop.permute.xlu0 %1871 }
0x1d69   :  { %v1874_v63 = vmul.f32 %v4016_v54, %v1872_v46 }
0x1d6b   :  { %v1876_v8 = vrot.slane %v1874_v63, 4  ;;  %v1989_v2 = vsel %vm1984_vm7, %v1988_v0, %v1874_v63 }
0x1d6d   :  { %1877 = vrot.lane.b32.xlu1 %v1876_v8, %s4150_s29 }
0x1ddf   :  { %v1878_v6 = vpop.permute.xlu1 %1877 }
0x1de0   :  { %3542 = vmatmul.mubr.msk.f32.vlgmr.msra.gmra.mrb[18].mxu1 %vm37_vm0, %v1878_v6  ;;  %v2189_v6 = vld [vmem:[#allocation2 + $0x147] sm:$0xff] }
0x1de1   :  { %3578 = vmatprep.mubr.msk.f32.mxu1 %vm4156_vm4, %v4153_v31 }
0x1eb3   :  { %v1947_v7 = vpop.f32.mrb[18].mxu1 }
0x1eb4   :  { %v1952_v3 = vrot.slane %v1947_v7, 2  ;;  %v3543_v9 = vpop.f32.mrb[19].mxu1  ;;  %v2190_v7 = vld [vmem:[#allocation2 + $0x14f] sm:$0xff] }
0x1eb5   :  { %v4507_v9 = vpack.c.bf16 %v2190_v7, %v2189_v6 }
0x1eb6   :  { %v1954_v12 = vadd.f32 %v1952_v3, %v4362_v30  ;;  %v2191_v3 = vld [vmem:[#allocation2 + $0x157] sm:$0xff] }
0x1eb7   :  { %3826 = vmatpush3.bf16.msra.mxu1 %v4507_v9 }
0x1eb8   :  { %4019 = vtanh.f32 %v1954_v12  ;;  %v3140_v16 = vmul.f32 -1.442695, %v1954_v12  ;;  %v2192_v12 = vld [vmem:[#allocation2 + $0x15f] sm:$0xff]  ;;  %3827 = vmatprep.subr.bf16.mxu1 %v4155_v5 }
0x1eba   :  { %4021 = vpow2.f32 %v3140_v16 }
0x1ec2   :  { %v4020_v15 = vpop.eup %4019 }
0x1ec3   :  { %1967 = vrot.lane.b32.xlu0 %v4020_v15, %s4154_s4  ;;  %v4510_v15 = vpack.c.bf16 %v2192_v12, %v2191_v3 }
0x1ec4   :  { %v4022_v17 = vpop.eup %4021 }
0x1ec5   :  { %v1958_v18 = vadd.f32 1.0, %v4022_v17  ;;  %3829 = vmatpush3.bf16.msra.mxu1 %v4510_v15 }
0x1ec6   :  { %3830 = vmatprep.subr.bf16.mxu1 %v4155_v5 }
0x1ec7   :  { %4023 = vrcp.f32 %v1958_v18 }
0x1ed1   :  { %v4024_v20 = vpop.eup %4023 }
0x1ed2   :  { %v1965_v28 = vmul.f32 %v4024_v20, %v1963_v11 }
0x1f35   :  { %v1968_v21 = vpop.permute.xlu0 %1967 }
0x1f36   :  { %v1970_v27 = vmul.f32 %v4024_v20, %v1968_v21 }
0x1f38   :  { %1972 = vrot.lane.b32.xlu1 %v1970_v27, %s4154_s4 }
0x1f3c   :  { %1993 = vrot.lane.b32.xlu1 %v4432_v1, %s4150_s29 }
0x1faa   :  { %v1973_v30 = vpop.permute.xlu1 %1972 }
0x1fab   :  { %v1975_v32 = vadd.f32 %v1973_v30, %v1965_v28 }
0x1fad   :  { %4025 = vtanh.f32 %v1975_v32 }
0x1fae   :  { %v1994_v4 = vpop.permute.xlu1 %1993 }
0x1fb7   :  { %v4026_v13 = vpop.eup %4025 }
0x1fb8   :  { %1978 = vrot.lane.b32.xlu0 %v4026_v13, %s4154_s4 }
0x202a   :  { %v1979_v33 = vpop.permute.xlu0 %1978 }
0x202b   :  { %v1981_v41 = vmul.f32 %v4024_v20, %v1979_v33 }
0x202d   :  { %v1990_v35 = vsel %vm1986_vm8, %v1989_v2, %v1981_v41 }
0x202e   :  { %1995 = vrot.lane.b32.xlu0 %v1990_v35, %s4150_s29 }
0x20a0   :  { %v1996_v24 = vpop.permute.xlu0 %1995 }
0x20a1   :  { %v3804_v45 = vpack.c.bf16 %v1996_v24, %v1994_v4 }
0x20a3   :  { %3805 = vmatprep.subr.bf16.mxu0 %v3804_v45 }
0x20a4   :  { %3807 = vmatpush3.bf16.msra.mxu0 %v3804_v45 }
0x20a5   :  { %3809 = vmatprep.subr.bf16.mxu0 %v3808_v42 }
0x20a7   :  { %3549 = vmatmul.mubr.msk.f32.vlgmr.msra.gmra.mrb[22].mxu0 %vm780_vm13, %v4352_v23 }
0x20a8   :  { %3811 = vmatpush3.bf16.msra.mxu0 %v3808_v42 }
0x20a9   :  { %3813 = vmatprep.subr.bf16.mxu0 %v3812_v19 }
0x20ac   :  { %3815 = vmatpush3.bf16.msra.mxu0 %v3812_v19 }
0x20ad   :  { %3817 = vmatprep.subr.bf16.mxu0 %v3816_v40 }
0x20b0   :  { %3819 = vmatpush3.bf16.msra.mxu0 %v3816_v40 }
0x20b1   :  { %3821 = vmatprep.subr.bf16.mxu0 %v3820_v29 }
0x20b4   :  { %3823 = vmatpush3.bf16.msra.mxu0 %v3820_v29 }
0x20b5   :  { %3836 = vmatprep.subr.bf16.mxu0 %v4155_v5 }
0x217a   :  { %v3550_v23 = vpop.f32.mrb[22].mxu0 }
0x217b   :  { %2078 = vrot.lane.b32.xlu0 %v3550_v23, %s4154_s4  ;;  %v2065_v47 = vpop.f32.mrb[23].mxu0  ;;  %v2089_v44 = vsel %vm780_vm13, %v1996_v24, %v3550_v23 }
0x217c   :  { %2076 = vrot.lane.b32.xlu1 %v2065_v47, %s4154_s4  ;;  %v2088_v49 = vsel %vm780_vm13, %v1994_v4, %v2065_v47 }
0x217f   :  { %2084 = vrot.lane.b32.xlu0 %v1990_v35, %s4149_s28 }
0x2180   :  { %2082 = vrot.lane.b32.xlu1 %v4432_v1, %s4149_s28  ;;  %v3143_v1 = vld [vmem:[#allocation2 + $0x146] ss:$0 sm:$0xff] }
0x21ed   :  { %v2079_v48 = vpop.permute.xlu0 %2078 }
0x21ee   :  { %v2077_v39 = vpop.permute.xlu1 %2076  ;;  %v2091_v51 = vsel %vm37_vm0, %v2089_v44, %v2079_v48 }
0x21ef   :  { %v2090_v50 = vsel %vm37_vm0, %v2088_v49, %v2077_v39 }
0x21f1   :  { %v2085_v36 = vpop.permute.xlu0 %2084 }
0x21f2   :  { %v2083_v34 = vpop.permute.xlu1 %2082  ;;  %v2094_v10 = vsel %vm2092_vm9, %v2091_v51, %v2085_v36 }
0x21f3   :  { %v2093_v52 = vsel %vm2092_vm9, %v2090_v50, %v2083_v34 }
0x21f4   :  { %3567 = vmatprep.mubr.msk.f32.mxu0 %vm512_vm6, %v2093_v52 }
0x21f5   :  { %3568 = vmatmul.mubr.msk.f32.vlgmr.msra.gmra.mrb[24].mxu0 %vm512_vm6, %v2094_v10  ;;  %vm3067_vm6 = vcmask 33792  }
0x21f6   :  { %3600 = vmatprep.mubr.msk.f32.mxu0 %vm4156_vm4, %v4153_v31  ;;  %3838 = vmatpush3.bf16.msra.mxu0 %v4507_v9 }
0x21f7   :  { %3839 = vmatprep.subr.bf16.mxu0 %v4155_v5 }
0x21fa   :  { %3841 = vmatpush3.bf16.msra.mxu0 %v4510_v15 }
0x21fb   :  { %3848 = vmatprep.subr.bf16.mxu0 %v4155_v5 }
0x22c8   :  { %v3569_v53 = vpop.f32.mrb[24].mxu0 }
0x22c9   :  { %v4499_v54 = vadd.f32 %v3569_v53, %v3143_v1  ;;  %v2180_v56 = vpop.f32.mrb[25].mxu0 }
0x22ca   :  { %v4501_v58 = vadd.f32 %v3143_v1, %v2180_v56 }
0x22cc   :  { %4027 = vtanh.f32 %v4501_v58  ;;  %v3146_v59 = vmul.f32 -1.442695, %v4501_v58 }
0x22ce   :  { %4029 = vpow2.f32 %v3146_v59 }
0x22d6   :  { %v4028_v14 = vpop.eup %4027 }
0x22d7   :  { %2202 = vrot.lane.b32.xlu1 %v4028_v14, %s4154_s4 }
0x22d8   :  { %v4030_v60 = vpop.eup %4029 }
0x22d9   :  { %v2196_v61 = vadd.f32 1.0, %v4030_v60 }
0x22db   :  { %4031 = vrcp.f32 %v2196_v61 }
0x22e5   :  { %v4032_v62 = vpop.eup %4031 }
0x22e6   :  { %v2200_v0 = vmul.f32 0.0, %v4032_v62 }
0x2349   :  { %v2203_v46 = vpop.permute.xlu1 %2202 }
0x234a   :  { %v2205_v63 = vmul.f32 %v4032_v62, %v2203_v46 }
0x234c   :  { %2207 = vrot.lane.b32.xlu0 %v2205_v63, %s4154_s4 }
0x23be   :  { %v2208_v8 = vpop.permute.xlu0 %2207 }
0x23bf   :  { %v2210_v2 = vadd.f32 %v2208_v8, %v2200_v0 }
0x23c1   :  { %4033 = vtanh.f32 %v2210_v2  ;;  %v2304_v24 = vrot.slane %v2210_v2, 6 }
0x23cb   :  { %v4034_v16 = vpop.eup %4033 }
0x23cc   :  { %2213 = vrot.lane.b32.xlu1 %v4034_v16, %s4154_s4 }
0x243e   :  { %v2214_v17 = vpop.permute.xlu1 %2213 }
0x243f   :  { %v4520_v18 = vmul.f32 %v4032_v62, %v2214_v17 }
0x2441   :  { %2218 = vrot.lane.b32.xlu0 %v4520_v18, %s4150_s29 }
0x24b3   :  { %v2219_v20 = vpop.permute.xlu0 %2218 }
0x24b4   :  { %3579 = vmatmul.mubr.msk.f32.vlgmr.msra.gmra.mrb[20].mxu1 %vm37_vm0, %v2219_v20 }
0x24b5   :  { %3832 = vmatpush3.bf16.msra.mxu1 %v4507_v9  ;;  %3589 = vmatprep.mubr.msk.f32.mxu1 %vm4156_vm4, %v4153_v31 }
0x24b6   :  { %3833 = vmatprep.subr.bf16.mxu1 %v4155_v5 }
0x24b9   :  { %3835 = vmatpush3.bf16.msra.mxu1 %v4510_v15 }
0x24ba   :  { %3842 = vmatprep.subr.bf16.mxu1 %v4155_v5 }
0x2587   :  { %v2288_v21 = vpop.f32.mrb[20].mxu1 }
0x2588   :  { %v2293_v27 = vrot.slane %v2288_v21, 6  ;;  %v3580_v11 = vpop.f32.mrb[21].mxu1 }
0x258a   :  { %v2295_v28 = vadd.f32 %v2293_v27, %v4501_v58 }
0x258c   :  { %4035 = vtanh.f32 %v2295_v28  ;;  %v3148_v32 = vmul.f32 -1.442695, %v2295_v28 }
0x258e   :  { %4037 = vpow2.f32 %v3148_v32 }
0x2596   :  { %v4036_v30 = vpop.eup %4035 }
0x2597   :  { %2308 = vrot.lane.b32.xlu1 %v4036_v30, %s4154_s4 }
0x2598   :  { %v4038_v13 = vpop.eup %4037 }
0x2599   :  { %v2299_v33 = vadd.f32 1.0, %v4038_v13 }
0x259b   :  { %4039 = vrcp.f32 %v2299_v33 }
0x25a5   :  { %v4040_v41 = vpop.eup %4039 }
0x25a6   :  { %v2306_v45 = vmul.f32 %v4040_v41, %v2304_v24 }
0x2609   :  { %v2309_v35 = vpop.permute.xlu1 %2308 }
0x260a   :  { %v2311_v4 = vmul.f32 %v4040_v41, %v2309_v35 }
0x260c   :  { %2313 = vrot.lane.b32.xlu0 %v2311_v4, %s4154_s4 }
0x267e   :  { %v2314_v25 = vpop.permute.xlu0 %2313 }
0x267f   :  { %v2316_v26 = vadd.f32 %v2314_v25, %v2306_v45 }
0x2681   :  { %4041 = vtanh.f32 %v2316_v26  ;;  %v2411_v44 = vrot.slane %v2316_v26, 6 }
0x268b   :  { %v4042_v55 = vpop.eup %4041 }
0x268c   :  { %2319 = vrot.lane.b32.xlu1 %v4042_v55, %s4154_s4 }
0x26fe   :  { %v2320_v42 = vpop.permute.xlu1 %2319 }
0x26ff   :  { %v2322_v37 = vmul.f32 %v4040_v41, %v2320_v42 }
0x2701   :  { %v2324_v19 = vrot.slane %v2322_v37, 2 }
0x2703   :  { %2325 = vrot.lane.b32.xlu0 %v2324_v19, %s4150_s29  ;;  %v2962_v53 = vadd.f32 %v2324_v19, %v4520_v18 }
0x2775   :  { %v2326_v38 = vpop.permute.xlu0 %2325 }
0x2776   :  { %3590 = vmatmul.mubr.msk.f32.vlgmr.msra.gmra.mrb[22].mxu1 %vm37_vm0, %v2326_v38 }
0x2777   :  { %3844 = vmatpush3.bf16.msra.mxu1 %v4507_v9  ;;  %3611 = vmatprep.mubr.msk.f32.mxu1 %vm4156_vm4, %v4153_v31 }
0x2778   :  { %3845 = vmatprep.subr.bf16.mxu1 %v4155_v5 }
0x277b   :  { %3847 = vmatpush3.bf16.msra.mxu1 %v4510_v15 }
0x277c   :  { %3854 = vmatprep.subr.bf16.mxu1 %v4155_v5 }
0x2849   :  { %v2395_v57 = vpop.f32.mrb[22].mxu1 }
0x284a   :  { %v2400_v40 = vrot.slane %v2395_v57, 4  ;;  %v3591_v22 = vpop.f32.mrb[23].mxu1 }
0x284c   :  { %v2402_v43 = vadd.f32 %v2400_v40, %v4501_v58 }
0x284e   :  { %4043 = vtanh.f32 %v2402_v43  ;;  %v3150_v23 = vmul.f32 -1.442695, %v2402_v43 }
0x2850   :  { %4045 = vpow2.f32 %v3150_v23 }
0x2858   :  { %v4044_v29 = vpop.eup %4043 }
0x2859   :  { %2415 = vrot.lane.b32.xlu1 %v4044_v29, %s4154_s4 }
0x285a   :  { %v4046_v47 = vpop.eup %4045 }
0x285b   :  { %v2406_v48 = vadd.f32 1.0, %v4046_v47 }
0x285d   :  { %4047 = vrcp.f32 %v2406_v48 }
0x2867   :  { %v4048_v39 = vpop.eup %4047 }
0x2868   :  { %v2413_v50 = vmul.f32 %v4048_v39, %v2411_v44 }
0x28cb   :  { %v2416_v49 = vpop.permute.xlu1 %2415 }
0x28cc   :  { %v2418_v36 = vmul.f32 %v4048_v39, %v2416_v49 }
0x28ce   :  { %2420 = vrot.lane.b32.xlu0 %v2418_v36, %s4154_s4 }
0x2940   :  { %v2421_v34 = vpop.permute.xlu0 %2420 }
0x2941   :  { %v2423_v51 = vadd.f32 %v2421_v34, %v2413_v50 }
0x2943   :  { %4049 = vtanh.f32 %v2423_v51  ;;  %v2518_v12 = vrot.slane %v2423_v51, 6 }
0x294d   :  { %v4050_v52 = vpop.eup %4049 }
0x294e   :  { %2426 = vrot.lane.b32.xlu1 %v4050_v52, %s4154_s4 }
0x29c0   :  { %v2427_v10 = vpop.permute.xlu1 %2426 }
0x29c1   :  { %v2429_v1 = vmul.f32 %v4048_v39, %v2427_v10 }
0x29c3   :  { %v2431_v56 = vrot.slane %v2429_v1, 4 }
0x29c5   :  { %v2964_v14 = vadd.f32 %v2962_v53, %v2431_v56  ;;  %2432 = vrot.lane.b32.xlu0 %v2431_v56, %s4150_s29 }
0x2a37   :  { %v2433_v59 = vpop.permute.xlu0 %2432 }
0x2a38   :  { %3601 = vmatmul.mubr.msk.f32.vlgmr.msra.gmra.mrb[26].mxu0 %vm37_vm0, %v2433_v59 }
0x2a39   :  { %3850 = vmatpush3.bf16.msra.mxu0 %v4507_v9  ;;  %3622 = vmatprep.mubr.msk.f32.mxu0 %vm4156_vm4, %v4153_v31 }
0x2a3a   :  { %3851 = vmatprep.subr.bf16.mxu0 %v4155_v5 }
0x2a3d   :  { %3853 = vmatpush3.bf16.msra.mxu0 %v4510_v15 }
0x2a3e   :  { %3860 = vmatprep.subr.bf16.mxu0 %v4155_v5 }
0x2b0b   :  { %v2502_v60 = vpop.f32.mrb[26].mxu0 }
0x2b0c   :  { %v2507_v61 = vrot.slane %v2502_v60, 2  ;;  %v3602_v62 = vpop.f32.mrb[27].mxu0 }
0x2b0e   :  { %v2509_v46 = vadd.f32 %v2507_v61, %v4501_v58 }
0x2b10   :  { %4051 = vtanh.f32 %v2509_v46  ;;  %v3152_v0 = vmul.f32 -1.442695, %v2509_v46 }
0x2b12   :  { %4053 = vpow2.f32 %v3152_v0 }
0x2b1a   :  { %v4052_v63 = vpop.eup %4051 }
0x2b1b   :  { %2522 = vrot.lane.b32.xlu1 %v4052_v63, %s4154_s4 }
0x2b1c   :  { %v4054_v8 = vpop.eup %4053 }
0x2b1d   :  { %v2513_v2 = vadd.f32 1.0, %v4054_v8 }
0x2b1f   :  { %4055 = vrcp.f32 %v2513_v2 }
0x2b29   :  { %v4056_v6 = vpop.eup %4055 }
0x2b2a   :  { %v2520_v16 = vmul.f32 %v4056_v6, %v2518_v12 }
0x2b8d   :  { %v2523_v7 = vpop.permute.xlu1 %2522 }
0x2b8e   :  { %v2525_v3 = vmul.f32 %v4056_v6, %v2523_v7 }
0x2b90   :  { %2527 = vrot.lane.b32.xlu0 %v2525_v3, %s4154_s4 }
0x2c02   :  { %v2528_v17 = vpop.permute.xlu0 %2527 }
0x2c03   :  { %v2530_v18 = vadd.f32 %v2528_v17, %v2520_v16 }
0x2c05   :  { %4057 = vtanh.f32 %v2530_v18  ;;  %v2622_v26 = vrot.slane %v2530_v18, 6 }
0x2c0f   :  { %v4058_v58 = vpop.eup %4057 }
0x2c10   :  { %2533 = vrot.lane.b32.xlu1 %v4058_v58, %s4154_s4 }
0x2c82   :  { %v2534_v20 = vpop.permute.xlu1 %2533 }
0x2c83   :  { %v2536_v21 = vmul.f32 %v4056_v6, %v2534_v20 }
0x2c85   :  { %v2538_v27 = vrot.slane %v2536_v21, 6 }
0x2c87   :  { %v2966_v11 = vadd.f32 %v2964_v14, %v2538_v27  ;;  %2539 = vrot.lane.b32.xlu0 %v2538_v27, %s4150_s29 }
0x2cf9   :  { %v2540_v28 = vpop.permute.xlu0 %2539 }
0x2cfa   :  { %3612 = vmatmul.mubr.msk.f32.vlgmr.msra.gmra.mrb[24].mxu1 %vm37_vm0, %v2540_v28 }
0x2cfb   :  { %3856 = vmatpush3.bf16.msra.mxu1 %v4507_v9  ;;  %3633 = vmatprep.mubr.msk.f32.mxu1 %vm4156_vm4, %v4153_v31 }
0x2cfc   :  { %3857 = vmatprep.subr.bf16.mxu1 %v4155_v5 }
0x2cff   :  { %3859 = vmatpush3.bf16.msra.mxu1 %v4510_v15 }
0x2d00   :  { %3866 = vmatprep.subr.bf16.mxu1 %v4155_v5 }
0x2dcd   :  { %v2609_v30 = vpop.f32.mrb[24].mxu1 }
0x2dce   :  { %v2613_v32 = vadd.f32 %v2609_v30, %v4499_v54  ;;  %v3613_v13 = vpop.f32.mrb[25].mxu1 }
0x2dd0   :  { %4059 = vtanh.f32 %v2613_v32  ;;  %v3154_v41 = vmul.f32 -1.442695, %v2613_v32 }
0x2dd2   :  { %4061 = vpow2.f32 %v3154_v41 }
0x2dda   :  { %v4060_v33 = vpop.eup %4059 }
0x2ddb   :  { %2626 = vrot.lane.b32.xlu1 %v4060_v33, %s4154_s4 }
0x2ddc   :  { %v4062_v35 = vpop.eup %4061 }
0x2ddd   :  { %v2617_v4 = vadd.f32 1.0, %v4062_v35 }
0x2ddf   :  { %4063 = vrcp.f32 %v2617_v4 }
0x2de9   :  { %v4064_v24 = vpop.eup %4063 }
0x2dea   :  { %v2624_v55 = vmul.f32 %v4064_v24, %v2622_v26 }
0x2e4d   :  { %v2627_v45 = vpop.permute.xlu1 %2626 }
0x2e4e   :  { %v2629_v25 = vmul.f32 %v4064_v24, %v2627_v45 }
0x2e50   :  { %2631 = vrot.lane.b32.xlu0 %v2629_v25, %s4154_s4 }
0x2ec2   :  { %v2632_v42 = vpop.permute.xlu0 %2631 }
0x2ec3   :  { %v2634_v37 = vadd.f32 %v2632_v42, %v2624_v55 }
0x2ec5   :  { %4065 = vtanh.f32 %v2634_v37 }
0x2ecf   :  { %v4066_v19 = vpop.eup %4065 }
0x2ed0   :  { %2637 = vrot.lane.b32.xlu1 %v4066_v19, %s4154_s4  ;;  %v2978_v19 = vld [vmem:[#allocation2 + $0x16f] sm:$0xff] }
0x2f42   :  { %v2638_v38 = vpop.permute.xlu1 %2637 }
0x2f43   :  { %v2640_v57 = vmul.f32 %v4064_v24, %v2638_v38  ;;  %v2979_v38 = vld [vmem:[#allocation2 + $0x177] sm:$0xff] }
0x2f45   :  { %v2967_v40 = vadd.f32 %v2966_v11, %v2640_v57  ;;  %2642 = vrot.lane.b32.xlu0 %v2640_v57, %s4150_s29 }
0x2fb7   :  { %v2643_v22 = vpop.permute.xlu0 %2642 }
0x2fb8   :  { %3623 = vmatmul.mubr.msk.f32.vlgmr.msra.gmra.mrb[28].mxu0 %vm37_vm0, %v2643_v22 }
0x2fb9   :  { %3862 = vmatpush3.bf16.msra.mxu0 %v4507_v9  ;;  %3644 = vmatprep.mubr.msk.f32.mxu0 %vm4156_vm4, %v4153_v31 }
0x2fba   :  { %3863 = vmatprep.subr.bf16.mxu0 %v4155_v5 }
0x2fbd   :  { %3865 = vmatpush3.bf16.msra.mxu0 %v4510_v15  ;;  %v2728_v15 = vrot.slane %v2634_v37, 6 }
0x308b   :  { %v2712_v43 = vpop.f32.mrb[28].mxu0 }
0x308c   :  { %v2717_v29 = vrot.slane %v2712_v43, 6  ;;  %v3624_v23 = vpop.f32.mrb[29].mxu0 }
0x308e   :  { %v2719_v47 = vadd.f32 %v2717_v29, %v4499_v54 }
0x3090   :  { %4067 = vtanh.f32 %v2719_v47  ;;  %v3156_v39 = vmul.f32 -1.442695, %v2719_v47 }
0x3092   :  { %4069 = vpow2.f32 %v3156_v39 }
0x309a   :  { %v4068_v48 = vpop.eup %4067 }
0x309b   :  { %2732 = vrot.lane.b32.xlu1 %v4068_v48, %s4154_s4 }
0x309c   :  { %v4070_v49 = vpop.eup %4069 }
0x309d   :  { %v2723_v9 = vadd.f32 1.0, %v4070_v49 }
0x309f   :  { %4071 = vrcp.f32 %v2723_v9  ;;  %v3161_v9 = vld [vmem:[#allocation2 + $0x187] ss:$0 sm:$0xff] }
0x30a9   :  { %v4072_v36 = vpop.eup %4071 }
0x30aa   :  { %v2730_v34 = vmul.f32 %v4072_v36, %v2728_v15 }
0x310d   :  { %v2733_v44 = vpop.permute.xlu1 %2732 }
0x310e   :  { %v2735_v50 = vmul.f32 %v4072_v36, %v2733_v44 }
0x3110   :  { %2737 = vrot.lane.b32.xlu0 %v2735_v50, %s4154_s4 }
0x3182   :  { %v2738_v51 = vpop.permute.xlu0 %2737 }
0x3183   :  { %v2740_v52 = vadd.f32 %v2738_v51, %v2730_v34 }
0x3185   :  { %4073 = vtanh.f32 %v2740_v52 }
0x318f   :  { %v4074_v10 = vpop.eup %4073 }
0x3190   :  { %2743 = vrot.lane.b32.xlu1 %v4074_v10, %s4154_s4 }
0x3202   :  { %v2744_v1 = vpop.permute.xlu1 %2743 }
0x3203   :  { %v2746_v53 = vmul.f32 %v4072_v36, %v2744_v1 }
0x3205   :  { %v2748_v56 = vrot.slane %v2746_v53, 2 }
0x3207   :  { %v2969_v14 = vadd.f32 %v2967_v40, %v2748_v56  ;;  %2749 = vrot.lane.b32.xlu0 %v2748_v56, %s4150_s29  ;;  %v2980_v40 = vld [vmem:[#allocation2 + $0x17f] sm:$0xff] }
0x3208   :  { %v3870_v22 = vpack.c.bf16 %v2980_v40, %v2979_v38 }
0x3279   :  { %v2750_v59 = vpop.permute.xlu0 %2749 }
0x327a   :  { %3634 = vmatmul.mubr.msk.f32.vlgmr.msra.gmra.mrb[26].mxu1 %vm37_vm0, %v2750_v59 }
0x327b   :  { %3655 = vmatprep.mubr.msk.f32.mxu1 %vm4156_vm4, %v4153_v31  ;;  %v2835_v31 = vrot.slane %v2740_v52, 6 }
0x334d   :  { %v2819_v60 = vpop.f32.mrb[26].mxu1 }
0x334e   :  { %v2824_v61 = vrot.slane %v2819_v60, 4  ;;  %v3635_v62 = vpop.f32.mrb[27].mxu1 }
0x3350   :  { %v2826_v46 = vadd.f32 %v2824_v61, %v4499_v54 }
0x3352   :  { %4075 = vtanh.f32 %v2826_v46  ;;  %v3158_v0 = vmul.f32 -1.442695, %v2826_v46 }
0x3354   :  { %4077 = vpow2.f32 %v3158_v0 }
0x335c   :  { %v4076_v63 = vpop.eup %4075 }
0x335d   :  { %2839 = vrot.lane.b32.xlu1 %v4076_v63, %s4154_s4 }
0x335e   :  { %v4078_v8 = vpop.eup %4077 }
0x335f   :  { %v2830_v2 = vadd.f32 1.0, %v4078_v8 }
0x3361   :  { %4079 = vrcp.f32 %v2830_v2 }
0x336b   :  { %v4080_v6 = vpop.eup %4079 }
0x336c   :  { %v2837_v12 = vmul.f32 %v4080_v6, %v2835_v31 }
0x33cf   :  { %v2840_v7 = vpop.permute.xlu1 %2839 }
0x33d0   :  { %v2842_v3 = vmul.f32 %v4080_v6, %v2840_v7 }
0x33d2   :  { %2844 = vrot.lane.b32.xlu0 %v2842_v3, %s4154_s4 }
0x3444   :  { %v2845_v16 = vpop.permute.xlu0 %2844 }
0x3445   :  { %v2847_v17 = vadd.f32 %v2845_v16, %v2837_v12 }
0x3447   :  { %4081 = vtanh.f32 %v2847_v17  ;;  %v2942_v26 = vrot.slane %v2847_v17, 6 }
0x3451   :  { %v4082_v18 = vpop.eup %4081 }
0x3452   :  { %2850 = vrot.lane.b32.xlu1 %v4082_v18, %s4154_s4 }
0x34c4   :  { %v2851_v58 = vpop.permute.xlu1 %2850 }
0x34c5   :  { %v2853_v20 = vmul.f32 %v4080_v6, %v2851_v58 }
0x34c7   :  { %v2855_v21 = vrot.slane %v2853_v20, 4 }
0x34c9   :  { %v2971_v27 = vadd.f32 %v2969_v14, %v2855_v21  ;;  %2856 = vrot.lane.b32.xlu0 %v2855_v21, %s4150_s29 }
0x353b   :  { %v2857_v11 = vpop.permute.xlu0 %2856 }
0x353c   :  { %3645 = vmatmul.mubr.msk.f32.vlgmr.msra.gmra.mrb[30].mxu0 %vm37_vm0, %v2857_v11 }
0x360f   :  { %v2926_v28 = vpop.f32.mrb[30].mxu0 }
0x3610   :  { %v2931_v30 = vrot.slane %v2926_v28, 2  ;;  %v3646_v32 = vpop.f32.mrb[31].mxu0 }
0x3612   :  { %v2933_v13 = vadd.f32 %v2931_v30, %v4499_v54  ;;  %v2977_v54 = vld [vmem:[#allocation2 + $0x167] sm:$0xff] }
0x3613   :  { %v3867_v57 = vpack.c.bf16 %v2978_v19, %v2977_v54 }
0x3614   :  { %4083 = vtanh.f32 %v2933_v13  ;;  %v3160_v41 = vmul.f32 -1.442695, %v2933_v13 }
0x3615   :  { %3868 = vmatpush3.bf16.msra.mxu1 %v3867_v57 }
0x3616   :  { %4085 = vpow2.f32 %v3160_v41  ;;  %3869 = vmatprep.subr.bf16.mxu1 %v4155_v5 }
0x3619   :  { %3871 = vmatpush3.bf16.msra.mxu1 %v3870_v22 }
0x361e   :  { %v4084_v33 = vpop.eup %4083 }
0x361f   :  { %2946 = vrot.lane.b32.xlu1 %v4084_v33, %s4154_s4 }
0x3620   :  { %v4086_v35 = vpop.eup %4085 }
0x3621   :  { %v2937_v4 = vadd.f32 1.0, %v4086_v35 }
0x3623   :  { %4087 = vrcp.f32 %v2937_v4 }
0x362d   :  { %v4088_v24 = vpop.eup %4087 }
0x362e   :  { %v2944_v55 = vmul.f32 %v4088_v24, %v2942_v26 }
0x3691   :  { %v2947_v45 = vpop.permute.xlu1 %2946 }
0x3692   :  { %v2949_v25 = vmul.f32 %v4088_v24, %v2947_v45 }
0x3694   :  { %2951 = vrot.lane.b32.xlu0 %v2949_v25, %s4154_s4 }
0x3706   :  { %v2952_v42 = vpop.permute.xlu0 %2951 }
0x3707   :  { %v2954_v37 = vadd.f32 %v2952_v42, %v2944_v55 }
0x3709   :  { %4089 = vtanh.f32 %v2954_v37 }
0x3713   :  { %v4090_v43 = vpop.eup %4089 }
0x3714   :  { %2957 = vrot.lane.b32.xlu1 %v4090_v43, %s4154_s4 }
0x3786   :  { %v2958_v29 = vpop.permute.xlu1 %2957 }
0x3787   :  { %v2960_v23 = vmul.f32 %v4088_v24, %v2958_v29 }
0x3789   :  { %v2973_v47 = vrot.slane %v2960_v23, 6 }
0x378b   :  { %v2975_v48 = vadd.f32 %v2973_v47, %v2971_v27 }
0x378d   :  { %v2976_v39 = vmul.f32 0.125, %v2975_v48 }
0x378f   :  { %2987 = vrot.lane.b32.xlu0 %v2976_v39, %s4150_s29 }
0x3801   :  { %v2988_v49 = vpop.permute.xlu0 %2987 }
0x3802   :  { %3656 = vmatmul.mubr.msk.f32.vlgmr.msra.gmra.mrb[28].mxu1 %vm37_vm0, %v2988_v49 }
0x38d5   :  { %v3057_v36 = vpop.f32.mrb[28].mxu1 }
0x38d6   :  { %v3058_v44 = vadd.f32 %v3161_v9, %v3057_v36  ;;  %v3657_v50 = vpop.f32.mrb[29].mxu1 }
0x38d8   :  { %v3163_v15 = vmul.f32 -1.442695, %v3058_v44 }
0x38da   :  { %4091 = vpow2.f32 %v3163_v15 }
0x38e4   :  { %v4092_v5 = vpop.eup %4091 }
0x38e5   :  { %v3064_v34 = vadd.f32 1.0, %v4092_v5 }
0x38e7   :  { %4093 = vrcp.f32 %v3064_v34 }
0x38f1   :  { %v4094_v51 = vpop.eup %4093 }
0x38f2   :  { %3068 = vst.msk [vmem:[#allocation5] sm:$0x3] %vm3067_vm6, %v4094_v51 }
0x38f3   :  { %4128 = shalt.err (!%p4125_p12)
}
0x38f4   :  { %s4129_s10 = scalar_lea.hbm %s4614_s2, 32 }
0x38f5   :  { %p4130_p13 = scmp.ne.s32.totalorder %s4614_s2, %s4129_s10  ;;  %p4133_p0 = scmp.lt.u32.totalorder %s4129_s10, %s4614_s2 }
0x38f7   :  { %p4135_p1 = pnand %p4133_p0, %p4130_p13 }
0x38f9   :  { %4138 = shalt.err (!%p4135_p1)
}
0x38fa   :  { %3078 = dma.vmem_to_hbm [thread:$0]  %s3076_s6, 32, %s4614_s2, [#allocation4]  }
0x38fb   :  { %4141 = dma.done.wait [#allocation4], 32  }
0x38fc   :  { %4142 = vsyncadd [#allocation4], 4294967264 }
0x38fd   :  { %3082 = vsyncpa [#allocation3], 1 }
0x38fe   :  { %3083 = vsyncpa [#allocation4], 1 }

</bundles_post_ra>
